<compile_context>
chip_gen: v7x
topology: tpu7x:2x2x1
jax: 0.10.0
libtpu: 0.0.40
codegen_flags: <defaults>
</compile_context>

<pallas_src>
import math
import functools

import jax
import jax.numpy as jnp
from jax import lax
from jax.experimental import pallas as pl
from jax.experimental.pallas import tpu as pltpu  # noqa: F401  (kept for TPU-specific knobs)

# ----------------------------- model config ---------------------------------
D_MODEL = 32
D_FF = 64
H = 4
D_K = D_MODEL // H
EPS = 1e-6          # PyTorch LayerNormalization eps (added to std, not var)
NEG = -1e30         # additive mask bias for masked positions (exp() underflows to 0)

# ------------------------- packed-parameter slab layout ----------------------
# One (PARAM_ROWS, 128) f32 slab; every block at a static, 8-aligned row offset.
ROW_LN12 = 0    # [ln1_a | ln1_b | ln2_a | ln2_b]                 (1, 128)
ROW_LN3 = 1     # [ln3_a | ln3_b | 0]                             (1, 128)
ROW_B1 = 2      # [bq1*s | bk1 | bv1 | bo1]                       (1, 128)
ROW_B2 = 3      # [bq2*s | bk2 | bv2 | bo2]                       (1, 128)
ROW_BFF = 4     # [b1 (64) | b2 (32) | 0]                         (1, 128)
ROW_W1 = 8      # rows  8:40   [wq1*s | wk1 | wv1 | wo1]          (32, 128)
ROW_W2 = 40     # rows 40:72   [wq2*s | wk2 | wv2 | wo2]          (32, 128)
ROW_WF1 = 72    # rows 72:104  [w1 (32x64) | 0]                   (32, 128)
ROW_WF2 = 104   # rows 104:168 [w2 (64x32) | 0]                   (64, 128)
PARAM_ROWS = 168


# ----------------------------- in-kernel helpers -----------------------------
def _layernorm(x, alpha, bias):
    # Matches the PyTorch LayerNormalization module:
    #   mean over last dim, *unbiased* std (torch.std default), eps added to std.
    d = x.shape[-1]
    mean = jnp.mean(x, axis=-1, keepdims=True)
    diff = x - mean
    var = jnp.sum(diff * diff, axis=-1, keepdims=True) * (1.0 / (d - 1))
    inv = pl.reciprocal(jnp.sqrt(var) + EPS)        # exact reciprocal (EUP, not VPU divide)
    return alpha * (diff * inv) + bias


def _mha(q, k, v, bias_slab, wo, bo, B, S_q, S_k):
    """Multi-head attention on flattened (B*S, D) slabs; no VMEM scratch.

    q: (B*S_q, D); k, v: (B*S_k, D); bias_slab: (B*H*S_q, S_k) additive mask
    bias already broadcast over heads.  The 1/sqrt(d_k) scale is folded into q.
    All per-(b, h) score blocks are concatenated into one slab so the softmax
    (max / exp / sum / reciprocal) runs once over dense sublanes; head outputs
    stay in vregs and feed a single full-Wo matmul.
    """
    blocks = []
    for b in range(B):
        qb = q[b * S_q:(b + 1) * S_q]
        kb = k[b * S_k:(b + 1) * S_k]
        for h in range(H):
            lo = h * D_K
            # contract last dims of both operands: MXU consumes "rhs transposed"
            # natively, no explicit .T / XLU transpose.
            blocks.append(lax.dot_general(
                qb[:, lo:lo + D_K], kb[:, lo:lo + D_K],
                dimension_numbers=(((1,), (1,)), ((), ())),
                preferred_element_type=jnp.float32))            # (S_q, S_k)

    scores = jnp.concatenate(blocks, axis=0) + bias_slab         # (B*H*S_q, S_k)
    m = jnp.max(scores, axis=-1, keepdims=True)
    e = jnp.exp(scores - m)
    p = e * pl.reciprocal(jnp.sum(e, axis=-1, keepdims=True))    # one slab softmax

    rows = []
    for b in range(B):
        vb = v[b * S_k:(b + 1) * S_k]
        cols = []
        for h in range(H):
            lo = h * D_K
            pb = p[(b * H + h) * S_q:(b * H + h + 1) * S_q]      # (S_q, S_k)
            cols.append(jnp.dot(pb, vb[:, lo:lo + D_K],
                                preferred_element_type=jnp.float32))
        rows.append(jnp.concatenate(cols, axis=1))               # (S_q, D)
    o = jnp.concatenate(rows, axis=0)                            # (B*S_q, D) in vregs
    return jnp.dot(o, wo, preferred_element_type=jnp.float32) + bo


# ----------------------------- fused Pallas kernel ---------------------------
def decoder_block_kernel(x_ref, enc_ref, mbias_ref, p_ref, o_ref, *, B, S_q, S_k):
    D, F = D_MODEL, D_FF
    x = x_ref[...]                                    # (B*S_q, D)
    enc = enc_ref[...]                                # (B*S_k, D)
    tgt_bias = mbias_ref[:, 0:S_q]                    # (B*H*S_q, S_q)
    src_bias = mbias_ref[:, S_q:S_q + S_k]            # (B*H*S_q, S_k)

    # ---- stage 1: x = x + SelfAttn(LN(x), tgt_mask) -------------------------
    xn = _layernorm(x, p_ref[ROW_LN12:ROW_LN12 + 1, 0:D],
                    p_ref[ROW_LN12:ROW_LN12 + 1, D:2 * D])
    qkv = jnp.dot(xn, p_ref[ROW_W1:ROW_W1 + D, 0:3 * D],
                  preferred_element_type=jnp.float32) + p_ref[ROW_B1:ROW_B1 + 1, 0:3 * D]
    x = x + _mha(qkv[:, 0:D], qkv[:, D:2 * D], qkv[:, 2 * D:3 * D], tgt_bias,
                 p_ref[ROW_W1:ROW_W1 + D, 3 * D:4 * D],
                 p_ref[ROW_B1:ROW_B1 + 1, 3 * D:4 * D], B, S_q, S_q)

    # ---- stage 2: x = x + CrossAttn(LN(x), enc, enc, src_mask) --------------
    xn = _layernorm(x, p_ref[ROW_LN12:ROW_LN12 + 1, 2 * D:3 * D],
                    p_ref[ROW_LN12:ROW_LN12 + 1, 3 * D:4 * D])
    q2 = jnp.dot(xn, p_ref[ROW_W2:ROW_W2 + D, 0:D],
                 preferred_element_type=jnp.float32) + p_ref[ROW_B2:ROW_B2 + 1, 0:D]
    kv = jnp.dot(enc, p_ref[ROW_W2:ROW_W2 + D, D:3 * D],
                 preferred_element_type=jnp.float32) + p_ref[ROW_B2:ROW_B2 + 1, D:3 * D]
    x = x + _mha(q2, kv[:, 0:D], kv[:, D:2 * D], src_bias,
                 p_ref[ROW_W2:ROW_W2 + D, 3 * D:4 * D],
                 p_ref[ROW_B2:ROW_B2 + 1, 3 * D:4 * D], B, S_q, S_k)

    # ---- stage 3: x = x + FFN(LN(x)) -----------------------------------------
    xn = _layernorm(x, p_ref[ROW_LN3:ROW_LN3 + 1, 0:D],
                    p_ref[ROW_LN3:ROW_LN3 + 1, D:2 * D])
    h1 = jnp.maximum(
        jnp.dot(xn, p_ref[ROW_WF1:ROW_WF1 + D, 0:F],
                preferred_element_type=jnp.float32) + p_ref[ROW_BFF:ROW_BFF + 1, 0:F],
        0.0)                                                     # relu (dropout = id)
    x = x + jnp.dot(h1, p_ref[ROW_WF2:ROW_WF2 + F, 0:D],
                    preferred_element_type=jnp.float32) + p_ref[ROW_BFF:ROW_BFF + 1, F:F + D]

    o_ref[...] = x


# ----------------------------- wrapper-side packing --------------------------
def _pad_row(pieces, width=128):
    row = jnp.concatenate([jnp.asarray(p, jnp.float32).reshape(-1) for p in pieces])
    return jnp.pad(row, (0, width - row.shape[0]))[None, :]


def _pad_block(mat, width=128):
    mat = jnp.asarray(mat, jnp.float32)
    return jnp.pad(mat, ((0, 0), (0, width - mat.shape[1])))


def _pack_params(params):
    """Pack every weight/bias/LN param into one (PARAM_ROWS, 128) f32 slab."""
    scale = 1.0 / math.sqrt(D_K)
    sa, ca, ff = params['self_attn'], params['cross_attn'], params['ffn']
    vec = jnp.concatenate([
        _pad_row([sa['ln_a'], sa['ln_b'], ca['ln_a'], ca['ln_b']]),          # ROW_LN12
        _pad_row([ff['ln_a'], ff['ln_b']]),                                  # ROW_LN3
        _pad_row([sa['bq'] * scale, sa['bk'], sa['bv'], sa['bo']]),          # ROW_B1
        _pad_row([ca['bq'] * scale, ca['bk'], ca['bv'], ca['bo']]),          # ROW_B2
        _pad_row([ff['b1'], ff['b2']]),                                      # ROW_BFF
        jnp.zeros((3, 128), jnp.float32),
    ], axis=0)                                                               # (8, 128)
    w_sa = jnp.concatenate([sa['wq_t'] * scale, sa['wk_t'], sa['wv_t'], sa['wo_t']], axis=1)
    w_ca = jnp.concatenate([ca['wq_t'] * scale, ca['wk_t'], ca['wv_t'], ca['wo_t']], axis=1)
    slab = jnp.concatenate([vec, w_sa, w_ca,
                            _pad_block(ff['w1_t']), _pad_block(ff['w2_t'])], axis=0)
    assert slab.shape == (PARAM_ROWS, 128)
    return slab


def _pack_mask_bias(src_mask, tgt_mask, B, S_q, S_k):
    """Additive mask biases, broadcast over heads, packed into one slab.

    NOTE: fully-masked rows yield a uniform softmax (finite -1e30 bias) instead
    of the reference's NaN from -inf masked_fill; equivalent for causal /
    all-ones masks.
    """
    tgt_b = jnp.where(tgt_mask == 0, jnp.float32(NEG), jnp.float32(0.0))   # (B, S_q, S_q)
    src_b = jnp.where(src_mask == 0, jnp.float32(NEG), jnp.float32(0.0))   # (B, S_q, S_k)
    tgt_slab = jnp.broadcast_to(tgt_b[:, None], (B, H, S_q, S_q)).reshape(B * H * S_q, S_q)
    src_slab = jnp.broadcast_to(src_b[:, None], (B, H, S_q, S_k)).reshape(B * H * S_q, S_k)
    return jnp.concatenate([tgt_slab, src_slab], axis=1)          # (B*H*S_q, S_q+S_k)


def decoder_block_forward(x, encoder_output, src_mask, tgt_mask, params):
    """DecoderBlock.forward, fully fused into one pallas_call (4 input DMAs)."""
    B, S_q, D = x.shape
    S_k = encoder_output.shape[1]
    kernel = functools.partial(decoder_block_kernel, B=B, S_q=S_q, S_k=S_k)
    out = pl.pallas_call(
        kernel,
        out_shape=jax.ShapeDtypeStruct((B * S_q, D), jnp.float32),
    )(x.reshape(B * S_q, D).astype(jnp.float32),
      encoder_output.reshape(B * S_k, D).astype(jnp.float32),
      _pack_mask_bias(src_mask, tgt_mask, B, S_q, S_k),
      _pack_params(params))
    return out.reshape(B, S_q, D)


# ----------------------------- parameter init --------------------------------
def _init_linear(key, d_in, d_out):
    k1, k2 = jax.random.split(key)
    lim = 1.0 / math.sqrt(d_in)
    w = jax.random.uniform(k1, (d_out, d_in), jnp.float32, -lim, lim)  # torch layout
    b = jax.random.uniform(k2, (d_out,), jnp.float32, -lim, lim)
    return w, b


def _init_attn_params(key):
    ks = jax.random.split(key, 4)
    wq, bq = _init_linear(ks[0], D_MODEL, D_MODEL)
    wk, bk = _init_linear(ks[1], D_MODEL, D_MODEL)
    wv, bv = _init_linear(ks[2], D_MODEL, D_MODEL)
    wo, bo = _init_linear(ks[3], D_MODEL, D_MODEL)
    return dict(ln_a=jnp.ones((D_MODEL,), jnp.float32),
                ln_b=jnp.zeros((D_MODEL,), jnp.float32),
                wq_t=wq.T, bq=bq, wk_t=wk.T, bk=bk,
                wv_t=wv.T, bv=bv, wo_t=wo.T, bo=bo)


def _init_ffn_params(key):
    k1, k2 = jax.random.split(key)
    w1, b1 = _init_linear(k1, D_MODEL, D_FF)
    w2, b2 = _init_linear(k2, D_FF, D_MODEL)
    return dict(ln_a=jnp.ones((D_MODEL,), jnp.float32),
                ln_b=jnp.zeros((D_MODEL,), jnp.float32),
                w1_t=w1.T, b1=b1, w2_t=w2.T, b2=b2)


# ----------------------------- pure-JAX reference ----------------------------
def _ref_layernorm(x, a, b):
    mean = jnp.mean(x, axis=-1, keepdims=True)
    diff = x - mean
    var = jnp.sum(diff * diff, axis=-1, keepdims=True) / (x.shape[-1] - 1)
    return a * (diff / (jnp.sqrt(var) + EPS)) + b


def _ref_mha(q_in, kv_in, mask, p):
    B, S_q, _ = q_in.shape
    S_k = kv_in.shape[1]
    q = (q_in @ p['wq_t'] + p['bq']).reshape(B, S_q, H, D_K).transpose(0, 2, 1, 3)
    k = (kv_in @ p['wk_t'] + p['bk']).reshape(B, S_k, H, D_K).transpose(0, 2, 1, 3)
    v = (kv_in @ p['wv_t'] + p['bv']).reshape(B, S_k, H, D_K).transpose(0, 2, 1, 3)
    scores = (q @ k.transpose(0, 1, 3, 2)) / math.sqrt(D_K)
    scores = jnp.where(mask[:, None, :, :] == 0, float('-inf'), scores)
    attn = jax.nn.softmax(scores, axis=-1)
    o = (attn @ v).transpose(0, 2, 1, 3).reshape(B, S_q, D_MODEL)
    return o @ p['wo_t'] + p['bo']


def _ref_decoder(x, enc, src_mask, tgt_mask, params):
    p = params['self_attn']
    xn = _ref_layernorm(x, p['ln_a'], p['ln_b'])
    x = x + _ref_mha(xn, xn, tgt_mask, p)
    p = params['cross_attn']
    x = x + _ref_mha(_ref_layernorm(x, p['ln_a'], p['ln_b']), enc, src_mask, p)
    p = params['ffn']
    xn = _ref_layernorm(x, p['ln_a'], p['ln_b'])
    h1 = jnp.maximum(xn @ p['w1_t'] + p['b1'], 0.0)
    return x + (h1 @ p['w2_t'] + p['b2'])


# ----------------------------- main ------------------------------------------
if __name__ == "__main__":
    B, S_TGT, S_SRC = 2, 8, 16

    key = jax.random.PRNGKey(0)
    k_x, k_enc, k_sa, k_ca, k_ff = jax.random.split(key, 5)

    x = jax.random.normal(k_x, (B, S_TGT, D_MODEL), jnp.float32)
    encoder_output = jax.random.normal(k_enc, (B, S_SRC, D_MODEL), jnp.float32)

    # target mask: causal; src mask: all visible (shapes (B, S_q, S_k))
    tgt_mask = jnp.broadcast_to(
        jnp.tril(jnp.ones((S_TGT, S_TGT), jnp.float32)), (B, S_TGT, S_TGT))
    src_mask = jnp.ones((B, S_TGT, S_SRC), jnp.float32)

    params = dict(self_attn=_init_attn_params(k_sa),
                  cross_attn=_init_attn_params(k_ca),
                  ffn=_init_ffn_params(k_ff))

    fwd = jax.jit(decoder_block_forward)
    out = fwd(x, encoder_output, src_mask, tgt_mask, params)
    out = jax.block_until_ready(out)

    ref = _ref_decoder(x, encoder_output, src_mask, tgt_mask, params)
    assert out.shape == (B, S_TGT, D_MODEL)
    assert jnp.allclose(out, ref, atol=5e-5, rtol=1e-5), "mismatch vs pure-JAX reference"

    print("KERNEL_OK")
</pallas_src>

<mosaic_0001>
module attributes {stable_mosaic.version = 11 : i64} {
  func.func @decoder_block_kernel(%arg0: memref<16x32xf32, #tpu.memory_space<vmem>>, %arg1: memref<32x32xf32, #tpu.memory_space<vmem>>, %arg2: memref<64x24xf32, #tpu.memory_space<vmem>>, %arg3: memref<168x128xf32, #tpu.memory_space<vmem>>, %arg4: memref<16x32xf32, #tpu.memory_space<vmem>>) attributes {dimension_semantics = [], scalar_prefetch = 0 : i64, scratch_operands = 0 : i64, tpu.core_type = #tpu.core_type<tc>} {
    %c0 = arith.constant 0 : index
    %c0_0 = arith.constant 0 : index
    %0 = vector.load %arg0[%c0, %c0_0] : memref<16x32xf32, #tpu.memory_space<vmem>>, vector<16x32xf32>
    %c0_1 = arith.constant 0 : index
    %c0_2 = arith.constant 0 : index
    %1 = vector.load %arg1[%c0_1, %c0_2] : memref<32x32xf32, #tpu.memory_space<vmem>>, vector<32x32xf32>
    %c0_3 = arith.constant 0 : index
    %c0_4 = arith.constant 0 : index
    %2 = vector.load %arg2[%c0_3, %c0_4] : memref<64x24xf32, #tpu.memory_space<vmem>>, vector<64x8xf32>
    %c0_5 = arith.constant 0 : index
    %c8 = arith.constant 8 : index
    %3 = vector.load %arg2[%c0_5, %c8] : memref<64x24xf32, #tpu.memory_space<vmem>>, vector<64x16xf32>
    %c0_6 = arith.constant 0 : index
    %c0_7 = arith.constant 0 : index
    %4 = vector.load %arg3[%c0_6, %c0_7] : memref<168x128xf32, #tpu.memory_space<vmem>>, vector<1x32xf32>
    %c0_8 = arith.constant 0 : index
    %c32 = arith.constant 32 : index
    %5 = vector.load %arg3[%c0_8, %c32] : memref<168x128xf32, #tpu.memory_space<vmem>>, vector<1x32xf32>
    %cst = arith.constant dense<0.000000e+00> : vector<16xf32>
    %6 = vector.multi_reduction <add>, %0, %cst [1] : vector<16x32xf32> to vector<16xf32>
    %7 = vector.shape_cast %6 : vector<16xf32> to vector<16x1xf32>
    %cst_9 = arith.constant 3.200000e+01 : f32
    %8 = vector.broadcast %cst_9 : f32 to vector<16x1xf32>
    %9 = arith.divf %7, %8 : vector<16x1xf32>
    %10 = vector.broadcast %9 : vector<16x1xf32> to vector<16x32xf32>
    %11 = arith.subf %0, %10 : vector<16x32xf32>
    %12 = arith.mulf %11, %11 : vector<16x32xf32>
    %cst_10 = arith.constant dense<0.000000e+00> : vector<16xf32>
    %13 = vector.multi_reduction <add>, %12, %cst_10 [1] : vector<16x32xf32> to vector<16xf32>
    %14 = vector.shape_cast %13 : vector<16xf32> to vector<16x1xf32>
    %cst_11 = arith.constant 0.0322580636 : f32
    %15 = vector.broadcast %cst_11 : f32 to vector<16x1xf32>
    %16 = arith.mulf %14, %15 : vector<16x1xf32>
    %17 = math.sqrt %16 : vector<16x1xf32>
    %cst_12 = arith.constant 9.99999997E-7 : f32
    %18 = vector.broadcast %cst_12 : f32 to vector<16x1xf32>
    %19 = arith.addf %17, %18 : vector<16x1xf32>
    %20 = tpu.reciprocal %19 : vector<16x1xf32> -> vector<16x1xf32>
    %21 = vector.broadcast %20 : vector<16x1xf32> to vector<16x32xf32>
    %22 = arith.mulf %11, %21 : vector<16x32xf32>
    %23 = vector.broadcast %4 : vector<1x32xf32> to vector<16x32xf32>
    %24 = arith.mulf %23, %22 : vector<16x32xf32>
    %25 = vector.broadcast %5 : vector<1x32xf32> to vector<16x32xf32>
    %26 = arith.addf %24, %25 : vector<16x32xf32>
    %c8_13 = arith.constant 8 : index
    %c0_14 = arith.constant 0 : index
    %27 = vector.load %arg3[%c8_13, %c0_14] : memref<168x128xf32, #tpu.memory_space<vmem>>, vector<32x96xf32>
    %cst_15 = arith.constant dense<0.000000e+00> : vector<16x96xf32>
    %28 = tpu.matmul %26, %27, %cst_15 {dimension_numbers = #tpu.dot_dimension_numbers<[1], [0], [0], [1], [0, 0, 1, 1], [], []>} : vector<16x32xf32>, vector<32x96xf32>, vector<16x96xf32> -> vector<16x96xf32>
    %c2 = arith.constant 2 : index
    %c0_16 = arith.constant 0 : index
    %29 = vector.load %arg3[%c2, %c0_16] : memref<168x128xf32, #tpu.memory_space<vmem>>, vector<1x96xf32>
    %30 = vector.broadcast %29 : vector<1x96xf32> to vector<16x96xf32>
    %31 = arith.addf %28, %30 : vector<16x96xf32>
    %32 = vector.extract_strided_slice %31 {offsets = [0, 0], sizes = [16, 32], strides = [1, 1]} : vector<16x96xf32> to vector<16x32xf32>
    %33 = vector.extract_strided_slice %31 {offsets = [0, 32], sizes = [16, 32], strides = [1, 1]} : vector<16x96xf32> to vector<16x32xf32>
    %34 = vector.extract_strided_slice %31 {offsets = [0, 64], sizes = [16, 32], strides = [1, 1]} : vector<16x96xf32> to vector<16x32xf32>
    %c8_17 = arith.constant 8 : index
    %c96 = arith.constant 96 : index
    %35 = vector.load %arg3[%c8_17, %c96] : memref<168x128xf32, #tpu.memory_space<vmem>>, vector<32x32xf32>
    %c2_18 = arith.constant 2 : index
    %c96_19 = arith.constant 96 : index
    %36 = vector.load %arg3[%c2_18, %c96_19] : memref<168x128xf32, #tpu.memory_space<vmem>>, vector<1x32xf32>
    %37 = vector.extract_strided_slice %32 {offsets = [0, 0], sizes = [8, 32], strides = [1, 1]} : vector<16x32xf32> to vector<8x32xf32>
    %38 = vector.extract_strided_slice %33 {offsets = [0, 0], sizes = [8, 32], strides = [1, 1]} : vector<16x32xf32> to vector<8x32xf32>
    %39 = vector.extract_strided_slice %37 {offsets = [0, 0], sizes = [8, 8], strides = [1, 1]} : vector<8x32xf32> to vector<8x8xf32>
    %40 = vector.extract_strided_slice %38 {offsets = [0, 0], sizes = [8, 8], strides = [1, 1]} : vector<8x32xf32> to vector<8x8xf32>
    %cst_20 = arith.constant dense<0.000000e+00> : vector<8x8xf32>
    %41 = tpu.matmul %39, %40, %cst_20 {dimension_numbers = #tpu.dot_dimension_numbers<[1], [1], [0], [0], [0, 0, 1, 0], [], []>} : vector<8x8xf32>, vector<8x8xf32>, vector<8x8xf32> -> vector<8x8xf32>
    %42 = vector.extract_strided_slice %37 {offsets = [0, 8], sizes = [8, 8], strides = [1, 1]} : vector<8x32xf32> to vector<8x8xf32>
    %43 = vector.extract_strided_slice %38 {offsets = [0, 8], sizes = [8, 8], strides = [1, 1]} : vector<8x32xf32> to vector<8x8xf32>
    %cst_21 = arith.constant dense<0.000000e+00> : vector<8x8xf32>
    %44 = tpu.matmul %42, %43, %cst_21 {dimension_numbers = #tpu.dot_dimension_numbers<[1], [1], [0], [0], [0, 0, 1, 0], [], []>} : vector<8x8xf32>, vector<8x8xf32>, vector<8x8xf32> -> vector<8x8xf32>
    %45 = vector.extract_strided_slice %37 {offsets = [0, 16], sizes = [8, 8], strides = [1, 1]} : vector<8x32xf32> to vector<8x8xf32>
    %46 = vector.extract_strided_slice %38 {offsets = [0, 16], sizes = [8, 8], strides = [1, 1]} : vector<8x32xf32> to vector<8x8xf32>
    %cst_22 = arith.constant dense<0.000000e+00> : vector<8x8xf32>
    %47 = tpu.matmul %45, %46, %cst_22 {dimension_numbers = #tpu.dot_dimension_numbers<[1], [1], [0], [0], [0, 0, 1, 0], [], []>} : vector<8x8xf32>, vector<8x8xf32>, vector<8x8xf32> -> vector<8x8xf32>
    %48 = vector.extract_strided_slice %37 {offsets = [0, 24], sizes = [8, 8], strides = [1, 1]} : vector<8x32xf32> to vector<8x8xf32>
    %49 = vector.extract_strided_slice %38 {offsets = [0, 24], sizes = [8, 8], strides = [1, 1]} : vector<8x32xf32> to vector<8x8xf32>
    %cst_23 = arith.constant dense<0.000000e+00> : vector<8x8xf32>
    %50 = tpu.matmul %48, %49, %cst_23 {dimension_numbers = #tpu.dot_dimension_numbers<[1], [1], [0], [0], [0, 0, 1, 0], [], []>} : vector<8x8xf32>, vector<8x8xf32>, vector<8x8xf32> -> vector<8x8xf32>
    %51 = vector.extract_strided_slice %32 {offsets = [8, 0], sizes = [8, 32], strides = [1, 1]} : vector<16x32xf32> to vector<8x32xf32>
    %52 = vector.extract_strided_slice %33 {offsets = [8, 0], sizes = [8, 32], strides = [1, 1]} : vector<16x32xf32> to vector<8x32xf32>
    %53 = vector.extract_strided_slice %51 {offsets = [0, 0], sizes = [8, 8], strides = [1, 1]} : vector<8x32xf32> to vector<8x8xf32>
    %54 = vector.extract_strided_slice %52 {offsets = [0, 0], sizes = [8, 8], strides = [1, 1]} : vector<8x32xf32> to vector<8x8xf32>
    %cst_24 = arith.constant dense<0.000000e+00> : vector<8x8xf32>
    %55 = tpu.matmul %53, %54, %cst_24 {dimension_numbers = #tpu.dot_dimension_numbers<[1], [1], [0], [0], [0, 0, 1, 0], [], []>} : vector<8x8xf32>, vector<8x8xf32>, vector<8x8xf32> -> vector<8x8xf32>
    %56 = vector.extract_strided_slice %51 {offsets = [0, 8], sizes = [8, 8], strides = [1, 1]} : vector<8x32xf32> to vector<8x8xf32>
    %57 = vector.extract_strided_slice %52 {offsets = [0, 8], sizes = [8, 8], strides = [1, 1]} : vector<8x32xf32> to vector<8x8xf32>
    %cst_25 = arith.constant dense<0.000000e+00> : vector<8x8xf32>
    %58 = tpu.matmul %56, %57, %cst_25 {dimension_numbers = #tpu.dot_dimension_numbers<[1], [1], [0], [0], [0, 0, 1, 0], [], []>} : vector<8x8xf32>, vector<8x8xf32>, vector<8x8xf32> -> vector<8x8xf32>
    %59 = vector.extract_strided_slice %51 {offsets = [0, 16], sizes = [8, 8], strides = [1, 1]} : vector<8x32xf32> to vector<8x8xf32>
    %60 = vector.extract_strided_slice %52 {offsets = [0, 16], sizes = [8, 8], strides = [1, 1]} : vector<8x32xf32> to vector<8x8xf32>
    %cst_26 = arith.constant dense<0.000000e+00> : vector<8x8xf32>
    %61 = tpu.matmul %59, %60, %cst_26 {dimension_numbers = #tpu.dot_dimension_numbers<[1], [1], [0], [0], [0, 0, 1, 0], [], []>} : vector<8x8xf32>, vector<8x8xf32>, vector<8x8xf32> -> vector<8x8xf32>
    %62 = vector.extract_strided_slice %51 {offsets = [0, 24], sizes = [8, 8], strides = [1, 1]} : vector<8x32xf32> to vector<8x8xf32>
    %63 = vector.extract_strided_slice %52 {offsets = [0, 24], sizes = [8, 8], strides = [1, 1]} : vector<8x32xf32> to vector<8x8xf32>
    %cst_27 = arith.constant dense<0.000000e+00> : vector<8x8xf32>
    %64 = tpu.matmul %62, %63, %cst_27 {dimension_numbers = #tpu.dot_dimension_numbers<[1], [1], [0], [0], [0, 0, 1, 0], [], []>} : vector<8x8xf32>, vector<8x8xf32>, vector<8x8xf32> -> vector<8x8xf32>
    %65 = tpu.concatenate %41, %44, %47, %50, %55, %58, %61, %64 in 0 : vector<8x8xf32>, vector<8x8xf32>, vector<8x8xf32>, vector<8x8xf32>, vector<8x8xf32>, vector<8x8xf32>, vector<8x8xf32>, vector<8x8xf32> -> vector<64x8xf32>
    %66 = arith.addf %65, %2 : vector<64x8xf32>
    %cst_28 = arith.constant dense<0xFF800000> : vector<64xf32>
    %67 = vector.multi_reduction <maximumf>, %66, %cst_28 [1] : vector<64x8xf32> to vector<64xf32>
    %68 = vector.shape_cast %67 : vector<64xf32> to vector<64x1xf32>
    %69 = vector.broadcast %68 : vector<64x1xf32> to vector<64x8xf32>
    %70 = arith.subf %66, %69 : vector<64x8xf32>
    %71 = math.exp %70 : vector<64x8xf32>
    %cst_29 = arith.constant dense<0.000000e+00> : vector<64xf32>
    %72 = vector.multi_reduction <add>, %71, %cst_29 [1] : vector<64x8xf32> to vector<64xf32>
    %73 = vector.shape_cast %72 : vector<64xf32> to vector<64x1xf32>
    %74 = tpu.reciprocal %73 : vector<64x1xf32> -> vector<64x1xf32>
    %75 = vector.broadcast %74 : vector<64x1xf32> to vector<64x8xf32>
    %76 = arith.mulf %71, %75 : vector<64x8xf32>
    %77 = vector.extract_strided_slice %34 {offsets = [0, 0], sizes = [8, 32], strides = [1, 1]} : vector<16x32xf32> to vector<8x32xf32>
    %78 = vector.extract_strided_slice %76 {offsets = [0, 0], sizes = [8, 8], strides = [1, 1]} : vector<64x8xf32> to vector<8x8xf32>
    %79 = vector.extract_strided_slice %77 {offsets = [0, 0], sizes = [8, 8], strides = [1, 1]} : vector<8x32xf32> to vector<8x8xf32>
    %cst_30 = arith.constant dense<0.000000e+00> : vector<8x8xf32>
    %80 = tpu.matmul %78, %79, %cst_30 {dimension_numbers = #tpu.dot_dimension_numbers<[1], [0], [0], [1], [0, 0, 1, 1], [], []>} : vector<8x8xf32>, vector<8x8xf32>, vector<8x8xf32> -> vector<8x8xf32>
    %81 = vector.extract_strided_slice %76 {offsets = [8, 0], sizes = [8, 8], strides = [1, 1]} : vector<64x8xf32> to vector<8x8xf32>
    %82 = vector.extract_strided_slice %77 {offsets = [0, 8], sizes = [8, 8], strides = [1, 1]} : vector<8x32xf32> to vector<8x8xf32>
    %cst_31 = arith.constant dense<0.000000e+00> : vector<8x8xf32>
    %83 = tpu.matmul %81, %82, %cst_31 {dimension_numbers = #tpu.dot_dimension_numbers<[1], [0], [0], [1], [0, 0, 1, 1], [], []>} : vector<8x8xf32>, vector<8x8xf32>, vector<8x8xf32> -> vector<8x8xf32>
    %84 = vector.extract_strided_slice %76 {offsets = [16, 0], sizes = [8, 8], strides = [1, 1]} : vector<64x8xf32> to vector<8x8xf32>
    %85 = vector.extract_strided_slice %77 {offsets = [0, 16], sizes = [8, 8], strides = [1, 1]} : vector<8x32xf32> to vector<8x8xf32>
    %cst_32 = arith.constant dense<0.000000e+00> : vector<8x8xf32>
    %86 = tpu.matmul %84, %85, %cst_32 {dimension_numbers = #tpu.dot_dimension_numbers<[1], [0], [0], [1], [0, 0, 1, 1], [], []>} : vector<8x8xf32>, vector<8x8xf32>, vector<8x8xf32> -> vector<8x8xf32>
    %87 = vector.extract_strided_slice %76 {offsets = [24, 0], sizes = [8, 8], strides = [1, 1]} : vector<64x8xf32> to vector<8x8xf32>
    %88 = vector.extract_strided_slice %77 {offsets = [0, 24], sizes = [8, 8], strides = [1, 1]} : vector<8x32xf32> to vector<8x8xf32>
    %cst_33 = arith.constant dense<0.000000e+00> : vector<8x8xf32>
    %89 = tpu.matmul %87, %88, %cst_33 {dimension_numbers = #tpu.dot_dimension_numbers<[1], [0], [0], [1], [0, 0, 1, 1], [], []>} : vector<8x8xf32>, vector<8x8xf32>, vector<8x8xf32> -> vector<8x8xf32>
    %90 = tpu.concatenate %80, %83, %86, %89 in 1 : vector<8x8xf32>, vector<8x8xf32>, vector<8x8xf32>, vector<8x8xf32> -> vector<8x32xf32>
    %91 = vector.extract_strided_slice %34 {offsets = [8, 0], sizes = [8, 32], strides = [1, 1]} : vector<16x32xf32> to vector<8x32xf32>
    %92 = vector.extract_strided_slice %76 {offsets = [32, 0], sizes = [8, 8], strides = [1, 1]} : vector<64x8xf32> to vector<8x8xf32>
    %93 = vector.extract_strided_slice %91 {offsets = [0, 0], sizes = [8, 8], strides = [1, 1]} : vector<8x32xf32> to vector<8x8xf32>
    %cst_34 = arith.constant dense<0.000000e+00> : vector<8x8xf32>
    %94 = tpu.matmul %92, %93, %cst_34 {dimension_numbers = #tpu.dot_dimension_numbers<[1], [0], [0], [1], [0, 0, 1, 1], [], []>} : vector<8x8xf32>, vector<8x8xf32>, vector<8x8xf32> -> vector<8x8xf32>
    %95 = vector.extract_strided_slice %76 {offsets = [40, 0], sizes = [8, 8], strides = [1, 1]} : vector<64x8xf32> to vector<8x8xf32>
    %96 = vector.extract_strided_slice %91 {offsets = [0, 8], sizes = [8, 8], strides = [1, 1]} : vector<8x32xf32> to vector<8x8xf32>
    %cst_35 = arith.constant dense<0.000000e+00> : vector<8x8xf32>
    %97 = tpu.matmul %95, %96, %cst_35 {dimension_numbers = #tpu.dot_dimension_numbers<[1], [0], [0], [1], [0, 0, 1, 1], [], []>} : vector<8x8xf32>, vector<8x8xf32>, vector<8x8xf32> -> vector<8x8xf32>
    %98 = vector.extract_strided_slice %76 {offsets = [48, 0], sizes = [8, 8], strides = [1, 1]} : vector<64x8xf32> to vector<8x8xf32>
    %99 = vector.extract_strided_slice %91 {offsets = [0, 16], sizes = [8, 8], strides = [1, 1]} : vector<8x32xf32> to vector<8x8xf32>
    %cst_36 = arith.constant dense<0.000000e+00> : vector<8x8xf32>
    %100 = tpu.matmul %98, %99, %cst_36 {dimension_numbers = #tpu.dot_dimension_numbers<[1], [0], [0], [1], [0, 0, 1, 1], [], []>} : vector<8x8xf32>, vector<8x8xf32>, vector<8x8xf32> -> vector<8x8xf32>
    %101 = vector.extract_strided_slice %76 {offsets = [56, 0], sizes = [8, 8], strides = [1, 1]} : vector<64x8xf32> to vector<8x8xf32>
    %102 = vector.extract_strided_slice %91 {offsets = [0, 24], sizes = [8, 8], strides = [1, 1]} : vector<8x32xf32> to vector<8x8xf32>
    %cst_37 = arith.constant dense<0.000000e+00> : vector<8x8xf32>
    %103 = tpu.matmul %101, %102, %cst_37 {dimension_numbers = #tpu.dot_dimension_numbers<[1], [0], [0], [1], [0, 0, 1, 1], [], []>} : vector<8x8xf32>, vector<8x8xf32>, vector<8x8xf32> -> vector<8x8xf32>
    %104 = tpu.concatenate %94, %97, %100, %103 in 1 : vector<8x8xf32>, vector<8x8xf32>, vector<8x8xf32>, vector<8x8xf32> -> vector<8x32xf32>
    %105 = tpu.concatenate %90, %104 in 0 : vector<8x32xf32>, vector<8x32xf32> -> vector<16x32xf32>
    %cst_38 = arith.constant dense<0.000000e+00> : vector<16x32xf32>
    %106 = tpu.matmul %105, %35, %cst_38 {dimension_numbers = #tpu.dot_dimension_numbers<[1], [0], [0], [1], [0, 0, 1, 1], [], []>} : vector<16x32xf32>, vector<32x32xf32>, vector<16x32xf32> -> vector<16x32xf32>
    %107 = vector.broadcast %36 : vector<1x32xf32> to vector<16x32xf32>
    %108 = arith.addf %106, %107 : vector<16x32xf32>
    %109 = arith.addf %0, %108 : vector<16x32xf32>
    %c0_39 = arith.constant 0 : index
    %c64 = arith.constant 64 : index
    %110 = vector.load %arg3[%c0_39, %c64] : memref<168x128xf32, #tpu.memory_space<vmem>>, vector<1x32xf32>
    %c0_40 = arith.constant 0 : index
    %c96_41 = arith.constant 96 : index
    %111 = vector.load %arg3[%c0_40, %c96_41] : memref<168x128xf32, #tpu.memory_space<vmem>>, vector<1x32xf32>
    %cst_42 = arith.constant dense<0.000000e+00> : vector<16xf32>
    %112 = vector.multi_reduction <add>, %109, %cst_42 [1] : vector<16x32xf32> to vector<16xf32>
    %113 = vector.shape_cast %112 : vector<16xf32> to vector<16x1xf32>
    %cst_43 = arith.constant 3.200000e+01 : f32
    %114 = vector.broadcast %cst_43 : f32 to vector<16x1xf32>
    %115 = arith.divf %113, %114 : vector<16x1xf32>
    %116 = vector.broadcast %115 : vector<16x1xf32> to vector<16x32xf32>
    %117 = arith.subf %109, %116 : vector<16x32xf32>
    %118 = arith.mulf %117, %117 : vector<16x32xf32>
    %cst_44 = arith.constant dense<0.000000e+00> : vector<16xf32>
    %119 = vector.multi_reduction <add>, %118, %cst_44 [1] : vector<16x32xf32> to vector<16xf32>
    %120 = vector.shape_cast %119 : vector<16xf32> to vector<16x1xf32>
    %cst_45 = arith.constant 0.0322580636 : f32
    %121 = vector.broadcast %cst_45 : f32 to vector<16x1xf32>
    %122 = arith.mulf %120, %121 : vector<16x1xf32>
    %123 = math.sqrt %122 : vector<16x1xf32>
    %cst_46 = arith.constant 9.99999997E-7 : f32
    %124 = vector.broadcast %cst_46 : f32 to vector<16x1xf32>
    %125 = arith.addf %123, %124 : vector<16x1xf32>
    %126 = tpu.reciprocal %125 : vector<16x1xf32> -> vector<16x1xf32>
    %127 = vector.broadcast %126 : vector<16x1xf32> to vector<16x32xf32>
    %128 = arith.mulf %117, %127 : vector<16x32xf32>
    %129 = vector.broadcast %110 : vector<1x32xf32> to vector<16x32xf32>
    %130 = arith.mulf %129, %128 : vector<16x32xf32>
    %131 = vector.broadcast %111 : vector<1x32xf32> to vector<16x32xf32>
    %132 = arith.addf %130, %131 : vector<16x32xf32>
    %c40 = arith.constant 40 : index
    %c0_47 = arith.constant 0 : index
    %133 = vector.load %arg3[%c40, %c0_47] : memref<168x128xf32, #tpu.memory_space<vmem>>, vector<32x32xf32>
    %cst_48 = arith.constant dense<0.000000e+00> : vector<16x32xf32>
    %134 = tpu.matmul %132, %133, %cst_48 {dimension_numbers = #tpu.dot_dimension_numbers<[1], [0], [0], [1], [0, 0, 1, 1], [], []>} : vector<16x32xf32>, vector<32x32xf32>, vector<16x32xf32> -> vector<16x32xf32>
    %c3 = arith.constant 3 : index
    %c0_49 = arith.constant 0 : index
    %135 = vector.load %arg3[%c3, %c0_49] : memref<168x128xf32, #tpu.memory_space<vmem>>, vector<1x32xf32>
    %136 = vector.broadcast %135 : vector<1x32xf32> to vector<16x32xf32>
    %137 = arith.addf %134, %136 : vector<16x32xf32>
    %c40_50 = arith.constant 40 : index
    %c32_51 = arith.constant 32 : index
    %138 = vector.load %arg3[%c40_50, %c32_51] : memref<168x128xf32, #tpu.memory_space<vmem>>, vector<32x64xf32>
    %cst_52 = arith.constant dense<0.000000e+00> : vector<32x64xf32>
    %139 = tpu.matmul %1, %138, %cst_52 {dimension_numbers = #tpu.dot_dimension_numbers<[1], [0], [0], [1], [0, 0, 1, 1], [], []>} : vector<32x32xf32>, vector<32x64xf32>, vector<32x64xf32> -> vector<32x64xf32>
    %c3_53 = arith.constant 3 : index
    %c32_54 = arith.constant 32 : index
    %140 = vector.load %arg3[%c3_53, %c32_54] : memref<168x128xf32, #tpu.memory_space<vmem>>, vector<1x64xf32>
    %141 = vector.broadcast %140 : vector<1x64xf32> to vector<32x64xf32>
    %142 = arith.addf %139, %141 : vector<32x64xf32>
    %143 = vector.extract_strided_slice %142 {offsets = [0, 0], sizes = [32, 32], strides = [1, 1]} : vector<32x64xf32> to vector<32x32xf32>
    %144 = vector.extract_strided_slice %142 {offsets = [0, 32], sizes = [32, 32], strides = [1, 1]} : vector<32x64xf32> to vector<32x32xf32>
    %c40_55 = arith.constant 40 : index
    %c96_56 = arith.constant 96 : index
    %145 = vector.load %arg3[%c40_55, %c96_56] : memref<168x128xf32, #tpu.memory_space<vmem>>, vector<32x32xf32>
    %c3_57 = arith.constant 3 : index
    %c96_58 = arith.constant 96 : index
    %146 = vector.load %arg3[%c3_57, %c96_58] : memref<168x128xf32, #tpu.memory_space<vmem>>, vector<1x32xf32>
    %147 = vector.extract_strided_slice %137 {offsets = [0, 0], sizes = [8, 32], strides = [1, 1]} : vector<16x32xf32> to vector<8x32xf32>
    %148 = vector.extract_strided_slice %143 {offsets = [0, 0], sizes = [16, 32], strides = [1, 1]} : vector<32x32xf32> to vector<16x32xf32>
    %149 = vector.extract_strided_slice %147 {offsets = [0, 0], sizes = [8, 8], strides = [1, 1]} : vector<8x32xf32> to vector<8x8xf32>
    %150 = vector.extract_strided_slice %148 {offsets = [0, 0], sizes = [16, 8], strides = [1, 1]} : vector<16x32xf32> to vector<16x8xf32>
    %cst_59 = arith.constant dense<0.000000e+00> : vector<8x16xf32>
    %151 = tpu.matmul %149, %150, %cst_59 {dimension_numbers = #tpu.dot_dimension_numbers<[1], [1], [0], [0], [0, 0, 1, 0], [], []>} : vector<8x8xf32>, vector<16x8xf32>, vector<8x16xf32> -> vector<8x16xf32>
    %152 = vector.extract_strided_slice %147 {offsets = [0, 8], sizes = [8, 8], strides = [1, 1]} : vector<8x32xf32> to vector<8x8xf32>
    %153 = vector.extract_strided_slice %148 {offsets = [0, 8], sizes = [16, 8], strides = [1, 1]} : vector<16x32xf32> to vector<16x8xf32>
    %cst_60 = arith.constant dense<0.000000e+00> : vector<8x16xf32>
    %154 = tpu.matmul %152, %153, %cst_60 {dimension_numbers = #tpu.dot_dimension_numbers<[1], [1], [0], [0], [0, 0, 1, 0], [], []>} : vector<8x8xf32>, vector<16x8xf32>, vector<8x16xf32> -> vector<8x16xf32>
    %155 = vector.extract_strided_slice %147 {offsets = [0, 16], sizes = [8, 8], strides = [1, 1]} : vector<8x32xf32> to vector<8x8xf32>
    %156 = vector.extract_strided_slice %148 {offsets = [0, 16], sizes = [16, 8], strides = [1, 1]} : vector<16x32xf32> to vector<16x8xf32>
    %cst_61 = arith.constant dense<0.000000e+00> : vector<8x16xf32>
    %157 = tpu.matmul %155, %156, %cst_61 {dimension_numbers = #tpu.dot_dimension_numbers<[1], [1], [0], [0], [0, 0, 1, 0], [], []>} : vector<8x8xf32>, vector<16x8xf32>, vector<8x16xf32> -> vector<8x16xf32>
    %158 = vector.extract_strided_slice %147 {offsets = [0, 24], sizes = [8, 8], strides = [1, 1]} : vector<8x32xf32> to vector<8x8xf32>
    %159 = vector.extract_strided_slice %148 {offsets = [0, 24], sizes = [16, 8], strides = [1, 1]} : vector<16x32xf32> to vector<16x8xf32>
    %cst_62 = arith.constant dense<0.000000e+00> : vector<8x16xf32>
    %160 = tpu.matmul %158, %159, %cst_62 {dimension_numbers = #tpu.dot_dimension_numbers<[1], [1], [0], [0], [0, 0, 1, 0], [], []>} : vector<8x8xf32>, vector<16x8xf32>, vector<8x16xf32> -> vector<8x16xf32>
    %161 = vector.extract_strided_slice %137 {offsets = [8, 0], sizes = [8, 32], strides = [1, 1]} : vector<16x32xf32> to vector<8x32xf32>
    %162 = vector.extract_strided_slice %143 {offsets = [16, 0], sizes = [16, 32], strides = [1, 1]} : vector<32x32xf32> to vector<16x32xf32>
    %163 = vector.extract_strided_slice %161 {offsets = [0, 0], sizes = [8, 8], strides = [1, 1]} : vector<8x32xf32> to vector<8x8xf32>
    %164 = vector.extract_strided_slice %162 {offsets = [0, 0], sizes = [16, 8], strides = [1, 1]} : vector<16x32xf32> to vector<16x8xf32>
    %cst_63 = arith.constant dense<0.000000e+00> : vector<8x16xf32>
    %165 = tpu.matmul %163, %164, %cst_63 {dimension_numbers = #tpu.dot_dimension_numbers<[1], [1], [0], [0], [0, 0, 1, 0], [], []>} : vector<8x8xf32>, vector<16x8xf32>, vector<8x16xf32> -> vector<8x16xf32>
    %166 = vector.extract_strided_slice %161 {offsets = [0, 8], sizes = [8, 8], strides = [1, 1]} : vector<8x32xf32> to vector<8x8xf32>
    %167 = vector.extract_strided_slice %162 {offsets = [0, 8], sizes = [16, 8], strides = [1, 1]} : vector<16x32xf32> to vector<16x8xf32>
    %cst_64 = arith.constant dense<0.000000e+00> : vector<8x16xf32>
    %168 = tpu.matmul %166, %167, %cst_64 {dimension_numbers = #tpu.dot_dimension_numbers<[1], [1], [0], [0], [0, 0, 1, 0], [], []>} : vector<8x8xf32>, vector<16x8xf32>, vector<8x16xf32> -> vector<8x16xf32>
    %169 = vector.extract_strided_slice %161 {offsets = [0, 16], sizes = [8, 8], strides = [1, 1]} : vector<8x32xf32> to vector<8x8xf32>
    %170 = vector.extract_strided_slice %162 {offsets = [0, 16], sizes = [16, 8], strides = [1, 1]} : vector<16x32xf32> to vector<16x8xf32>
    %cst_65 = arith.constant dense<0.000000e+00> : vector<8x16xf32>
    %171 = tpu.matmul %169, %170, %cst_65 {dimension_numbers = #tpu.dot_dimension_numbers<[1], [1], [0], [0], [0, 0, 1, 0], [], []>} : vector<8x8xf32>, vector<16x8xf32>, vector<8x16xf32> -> vector<8x16xf32>
    %172 = vector.extract_strided_slice %161 {offsets = [0, 24], sizes = [8, 8], strides = [1, 1]} : vector<8x32xf32> to vector<8x8xf32>
    %173 = vector.extract_strided_slice %162 {offsets = [0, 24], sizes = [16, 8], strides = [1, 1]} : vector<16x32xf32> to vector<16x8xf32>
    %cst_66 = arith.constant dense<0.000000e+00> : vector<8x16xf32>
    %174 = tpu.matmul %172, %173, %cst_66 {dimension_numbers = #tpu.dot_dimension_numbers<[1], [1], [0], [0], [0, 0, 1, 0], [], []>} : vector<8x8xf32>, vector<16x8xf32>, vector<8x16xf32> -> vector<8x16xf32>
    %175 = tpu.concatenate %151, %154, %157, %160, %165, %168, %171, %174 in 0 : vector<8x16xf32>, vector<8x16xf32>, vector<8x16xf32>, vector<8x16xf32>, vector<8x16xf32>, vector<8x16xf32>, vector<8x16xf32>, vector<8x16xf32> -> vector<64x16xf32>
    %176 = arith.addf %175, %3 : vector<64x16xf32>
    %cst_67 = arith.constant dense<0xFF800000> : vector<64xf32>
    %177 = vector.multi_reduction <maximumf>, %176, %cst_67 [1] : vector<64x16xf32> to vector<64xf32>
    %178 = vector.shape_cast %177 : vector<64xf32> to vector<64x1xf32>
    %179 = vector.broadcast %178 : vector<64x1xf32> to vector<64x16xf32>
    %180 = arith.subf %176, %179 : vector<64x16xf32>
    %181 = math.exp %180 : vector<64x16xf32>
    %cst_68 = arith.constant dense<0.000000e+00> : vector<64xf32>
    %182 = vector.multi_reduction <add>, %181, %cst_68 [1] : vector<64x16xf32> to vector<64xf32>
    %183 = vector.shape_cast %182 : vector<64xf32> to vector<64x1xf32>
    %184 = tpu.reciprocal %183 : vector<64x1xf32> -> vector<64x1xf32>
    %185 = vector.broadcast %184 : vector<64x1xf32> to vector<64x16xf32>
    %186 = arith.mulf %181, %185 : vector<64x16xf32>
    %187 = vector.extract_strided_slice %144 {offsets = [0, 0], sizes = [16, 32], strides = [1, 1]} : vector<32x32xf32> to vector<16x32xf32>
    %188 = vector.extract_strided_slice %186 {offsets = [0, 0], sizes = [8, 16], strides = [1, 1]} : vector<64x16xf32> to vector<8x16xf32>
    %189 = vector.extract_strided_slice %187 {offsets = [0, 0], sizes = [16, 8], strides = [1, 1]} : vector<16x32xf32> to vector<16x8xf32>
    %cst_69 = arith.constant dense<0.000000e+00> : vector<8x8xf32>
    %190 = tpu.matmul %188, %189, %cst_69 {dimension_numbers = #tpu.dot_dimension_numbers<[1], [0], [0], [1], [0, 0, 1, 1], [], []>} : vector<8x16xf32>, vector<16x8xf32>, vector<8x8xf32> -> vector<8x8xf32>
    %191 = vector.extract_strided_slice %186 {offsets = [8, 0], sizes = [8, 16], strides = [1, 1]} : vector<64x16xf32> to vector<8x16xf32>
    %192 = vector.extract_strided_slice %187 {offsets = [0, 8], sizes = [16, 8], strides = [1, 1]} : vector<16x32xf32> to vector<16x8xf32>
    %cst_70 = arith.constant dense<0.000000e+00> : vector<8x8xf32>
    %193 = tpu.matmul %191, %192, %cst_70 {dimension_numbers = #tpu.dot_dimension_numbers<[1], [0], [0], [1], [0, 0, 1, 1], [], []>} : vector<8x16xf32>, vector<16x8xf32>, vector<8x8xf32> -> vector<8x8xf32>
    %194 = vector.extract_strided_slice %186 {offsets = [16, 0], sizes = [8, 16], strides = [1, 1]} : vector<64x16xf32> to vector<8x16xf32>
    %195 = vector.extract_strided_slice %187 {offsets = [0, 16], sizes = [16, 8], strides = [1, 1]} : vector<16x32xf32> to vector<16x8xf32>
    %cst_71 = arith.constant dense<0.000000e+00> : vector<8x8xf32>
    %196 = tpu.matmul %194, %195, %cst_71 {dimension_numbers = #tpu.dot_dimension_numbers<[1], [0], [0], [1], [0, 0, 1, 1], [], []>} : vector<8x16xf32>, vector<16x8xf32>, vector<8x8xf32> -> vector<8x8xf32>
    %197 = vector.extract_strided_slice %186 {offsets = [24, 0], sizes = [8, 16], strides = [1, 1]} : vector<64x16xf32> to vector<8x16xf32>
    %198 = vector.extract_strided_slice %187 {offsets = [0, 24], sizes = [16, 8], strides = [1, 1]} : vector<16x32xf32> to vector<16x8xf32>
    %cst_72 = arith.constant dense<0.000000e+00> : vector<8x8xf32>
    %199 = tpu.matmul %197, %198, %cst_72 {dimension_numbers = #tpu.dot_dimension_numbers<[1], [0], [0], [1], [0, 0, 1, 1], [], []>} : vector<8x16xf32>, vector<16x8xf32>, vector<8x8xf32> -> vector<8x8xf32>
    %200 = tpu.concatenate %190, %193, %196, %199 in 1 : vector<8x8xf32>, vector<8x8xf32>, vector<8x8xf32>, vector<8x8xf32> -> vector<8x32xf32>
    %201 = vector.extract_strided_slice %144 {offsets = [16, 0], sizes = [16, 32], strides = [1, 1]} : vector<32x32xf32> to vector<16x32xf32>
    %202 = vector.extract_strided_slice %186 {offsets = [32, 0], sizes = [8, 16], strides = [1, 1]} : vector<64x16xf32> to vector<8x16xf32>
    %203 = vector.extract_strided_slice %201 {offsets = [0, 0], sizes = [16, 8], strides = [1, 1]} : vector<16x32xf32> to vector<16x8xf32>
    %cst_73 = arith.constant dense<0.000000e+00> : vector<8x8xf32>
    %204 = tpu.matmul %202, %203, %cst_73 {dimension_numbers = #tpu.dot_dimension_numbers<[1], [0], [0], [1], [0, 0, 1, 1], [], []>} : vector<8x16xf32>, vector<16x8xf32>, vector<8x8xf32> -> vector<8x8xf32>
    %205 = vector.extract_strided_slice %186 {offsets = [40, 0], sizes = [8, 16], strides = [1, 1]} : vector<64x16xf32> to vector<8x16xf32>
    %206 = vector.extract_strided_slice %201 {offsets = [0, 8], sizes = [16, 8], strides = [1, 1]} : vector<16x32xf32> to vector<16x8xf32>
    %cst_74 = arith.constant dense<0.000000e+00> : vector<8x8xf32>
    %207 = tpu.matmul %205, %206, %cst_74 {dimension_numbers = #tpu.dot_dimension_numbers<[1], [0], [0], [1], [0, 0, 1, 1], [], []>} : vector<8x16xf32>, vector<16x8xf32>, vector<8x8xf32> -> vector<8x8xf32>
    %208 = vector.extract_strided_slice %186 {offsets = [48, 0], sizes = [8, 16], strides = [1, 1]} : vector<64x16xf32> to vector<8x16xf32>
    %209 = vector.extract_strided_slice %201 {offsets = [0, 16], sizes = [16, 8], strides = [1, 1]} : vector<16x32xf32> to vector<16x8xf32>
    %cst_75 = arith.constant dense<0.000000e+00> : vector<8x8xf32>
    %210 = tpu.matmul %208, %209, %cst_75 {dimension_numbers = #tpu.dot_dimension_numbers<[1], [0], [0], [1], [0, 0, 1, 1], [], []>} : vector<8x16xf32>, vector<16x8xf32>, vector<8x8xf32> -> vector<8x8xf32>
    %211 = vector.extract_strided_slice %186 {offsets = [56, 0], sizes = [8, 16], strides = [1, 1]} : vector<64x16xf32> to vector<8x16xf32>
    %212 = vector.extract_strided_slice %201 {offsets = [0, 24], sizes = [16, 8], strides = [1, 1]} : vector<16x32xf32> to vector<16x8xf32>
    %cst_76 = arith.constant dense<0.000000e+00> : vector<8x8xf32>
    %213 = tpu.matmul %211, %212, %cst_76 {dimension_numbers = #tpu.dot_dimension_numbers<[1], [0], [0], [1], [0, 0, 1, 1], [], []>} : vector<8x16xf32>, vector<16x8xf32>, vector<8x8xf32> -> vector<8x8xf32>
    %214 = tpu.concatenate %204, %207, %210, %213 in 1 : vector<8x8xf32>, vector<8x8xf32>, vector<8x8xf32>, vector<8x8xf32> -> vector<8x32xf32>
    %215 = tpu.concatenate %200, %214 in 0 : vector<8x32xf32>, vector<8x32xf32> -> vector<16x32xf32>
    %cst_77 = arith.constant dense<0.000000e+00> : vector<16x32xf32>
    %216 = tpu.matmul %215, %145, %cst_77 {dimension_numbers = #tpu.dot_dimension_numbers<[1], [0], [0], [1], [0, 0, 1, 1], [], []>} : vector<16x32xf32>, vector<32x32xf32>, vector<16x32xf32> -> vector<16x32xf32>
    %217 = vector.broadcast %146 : vector<1x32xf32> to vector<16x32xf32>
    %218 = arith.addf %216, %217 : vector<16x32xf32>
    %219 = arith.addf %109, %218 : vector<16x32xf32>
    %c1 = arith.constant 1 : index
    %c0_78 = arith.constant 0 : index
    %220 = vector.load %arg3[%c1, %c0_78] : memref<168x128xf32, #tpu.memory_space<vmem>>, vector<1x32xf32>
    %c1_79 = arith.constant 1 : index
    %c32_80 = arith.constant 32 : index
    %221 = vector.load %arg3[%c1_79, %c32_80] : memref<168x128xf32, #tpu.memory_space<vmem>>, vector<1x32xf32>
    %cst_81 = arith.constant dense<0.000000e+00> : vector<16xf32>
    %222 = vector.multi_reduction <add>, %219, %cst_81 [1] : vector<16x32xf32> to vector<16xf32>
    %223 = vector.shape_cast %222 : vector<16xf32> to vector<16x1xf32>
    %cst_82 = arith.constant 3.200000e+01 : f32
    %224 = vector.broadcast %cst_82 : f32 to vector<16x1xf32>
    %225 = arith.divf %223, %224 : vector<16x1xf32>
    %226 = vector.broadcast %225 : vector<16x1xf32> to vector<16x32xf32>
    %227 = arith.subf %219, %226 : vector<16x32xf32>
    %228 = arith.mulf %227, %227 : vector<16x32xf32>
    %cst_83 = arith.constant dense<0.000000e+00> : vector<16xf32>
    %229 = vector.multi_reduction <add>, %228, %cst_83 [1] : vector<16x32xf32> to vector<16xf32>
    %230 = vector.shape_cast %229 : vector<16xf32> to vector<16x1xf32>
    %cst_84 = arith.constant 0.0322580636 : f32
    %231 = vector.broadcast %cst_84 : f32 to vector<16x1xf32>
    %232 = arith.mulf %230, %231 : vector<16x1xf32>
    %233 = math.sqrt %232 : vector<16x1xf32>
    %cst_85 = arith.constant 9.99999997E-7 : f32
    %234 = vector.broadcast %cst_85 : f32 to vector<16x1xf32>
    %235 = arith.addf %233, %234 : vector<16x1xf32>
    %236 = tpu.reciprocal %235 : vector<16x1xf32> -> vector<16x1xf32>
    %237 = vector.broadcast %236 : vector<16x1xf32> to vector<16x32xf32>
    %238 = arith.mulf %227, %237 : vector<16x32xf32>
    %239 = vector.broadcast %220 : vector<1x32xf32> to vector<16x32xf32>
    %240 = arith.mulf %239, %238 : vector<16x32xf32>
    %241 = vector.broadcast %221 : vector<1x32xf32> to vector<16x32xf32>
    %242 = arith.addf %240, %241 : vector<16x32xf32>
    %c72 = arith.constant 72 : index
    %c0_86 = arith.constant 0 : index
    %243 = vector.load %arg3[%c72, %c0_86] : memref<168x128xf32, #tpu.memory_space<vmem>>, vector<32x64xf32>
    %cst_87 = arith.constant dense<0.000000e+00> : vector<16x64xf32>
    %244 = tpu.matmul %242, %243, %cst_87 {dimension_numbers = #tpu.dot_dimension_numbers<[1], [0], [0], [1], [0, 0, 1, 1], [], []>} : vector<16x32xf32>, vector<32x64xf32>, vector<16x64xf32> -> vector<16x64xf32>
    %c4 = arith.constant 4 : index
    %c0_88 = arith.constant 0 : index
    %245 = vector.load %arg3[%c4, %c0_88] : memref<168x128xf32, #tpu.memory_space<vmem>>, vector<1x64xf32>
    %246 = vector.broadcast %245 : vector<1x64xf32> to vector<16x64xf32>
    %247 = arith.addf %244, %246 : vector<16x64xf32>
    %cst_89 = arith.constant 0.000000e+00 : f32
    %248 = vector.broadcast %cst_89 : f32 to vector<16x64xf32>
    %249 = arith.maximumf %247, %248 : vector<16x64xf32>
    %c104 = arith.constant 104 : index
    %c0_90 = arith.constant 0 : index
    %250 = vector.load %arg3[%c104, %c0_90] : memref<168x128xf32, #tpu.memory_space<vmem>>, vector<64x32xf32>
    %cst_91 = arith.constant dense<0.000000e+00> : vector<16x32xf32>
    %251 = tpu.matmul %249, %250, %cst_91 {dimension_numbers = #tpu.dot_dimension_numbers<[1], [0], [0], [1], [0, 0, 1, 1], [], []>} : vector<16x64xf32>, vector<64x32xf32>, vector<16x32xf32> -> vector<16x32xf32>
    %252 = arith.addf %219, %251 : vector<16x32xf32>
    %c4_92 = arith.constant 4 : index
    %c64_93 = arith.constant 64 : index
    %253 = vector.load %arg3[%c4_92, %c64_93] : memref<168x128xf32, #tpu.memory_space<vmem>>, vector<1x32xf32>
    %254 = vector.broadcast %253 : vector<1x32xf32> to vector<16x32xf32>
    %255 = arith.addf %252, %254 : vector<16x32xf32>
    %c0_94 = arith.constant 0 : index
    %c0_95 = arith.constant 0 : index
    %256 = vector.load %arg4[%c0_94, %c0_95] : memref<16x32xf32, #tpu.memory_space<vmem>>, vector<16x32xf32>
    tpu.vector_store %arg4[%c0_94, %c0_95], %255 {strides = array<i32>} : memref<16x32xf32, #tpu.memory_space<vmem>>, vector<16x32xf32>,
    return
  }
}

</mosaic_0001>

<bundles_post_ra>
// kernel: decoder_block_forward.1
= control target key start
LH: loop header
LB: loop body
LE: loop exit
PB: predicated region body
PF: predicated region fallthrough
CT: control target
= control target key end

     0   :  { %vm33_vm0 = vcmask 261120   ;;  %s5231_s0 = inlined_call_operand.vmem [shape: f32[16,32], index: 0, kind: input, shape index: {}]   ;;  %s5232_s1 = inlined_call_operand.vmem [shape: f32[32,32], index: 1, kind: input, shape index: {}]   ;;  %s5233_s2 = inlined_call_operand.vmem [shape: f32[64,24], index: 2, kind: input, shape index: {}]   ;;  %s5234_s3 = inlined_call_operand.vmem [shape: f32[168,128], index: 3, kind: input, shape index: {}]   ;;  %s5235_s4 = inlined_call_operand.hbm [shape: f32[16,32], index: 4, kind: output, shape index: {}]  }
   0x1   :  { %v4586_v0 = vld [vmem:[%s5231_s0] sm:$0xff]  ;;  %v4591_v1 = vld [vmem:[%s5231_s0 + $0x8] sm:$0xff] }
   0x2   :  { %9 = vsyncpa [#allocation3], 0  ;;  %v34_v2 = vsel %vm33_vm0, %v4586_v0, 0.0  ;;  %v37_v3 = vsel %vm33_vm0, %v4591_v1, 0.0  ;;  %v4600_v4 = vld [vmem:[%s5234_s3] ss:$0 sm:$0xff] }
   0x3   :  { %35 = vadd.xlane.f32.xlu0 %v34_v2  ;;  %s4538_s21 = smov 96   ;;  %v4611_v15 = vld [vmem:[%s5234_s3 + $0x8] sm:$0xff]  ;;  %v4616_v16 = vld [vmem:[%s5234_s3 + $0x10] sm:$0xff]  ;;  %v4621_v17 = vld [vmem:[%s5234_s3 + $0x18] sm:$0xff]  ;;  %v4539_v47 = vmov 0.0   ;;  %vm4540_vm5 = vmmov 0  }
   0x4   :  { %v4326_v18 = vpack.i.bf16 %v4616_v16, %v4611_v15  ;;  %v4186_v19 = vpack.c.bf16 %v4616_v16, %v4611_v15  ;;  %v4630_v20 = vld [vmem:[%s5234_s3 + $0x20] sm:$0xff]  ;;  %3927 = vmatprep.subr.mxu0 %v4539_v47  ;;  %3929 = vmatprep.mubr.msk.f32.mxu0 %vm4540_vm5, %v4539_v47  ;;  %s4541_s5 = smov 88   ;;  %s4542_s6 = smov 80   ;;  %vm180_vm6 = vcmask 64512   ;;  %vm1213_vm7 = vcmask 130048  }
   0x5   :  { %v4190_v21 = vpack.c.bf16 %v4630_v20, %v4621_v17  ;;  %v4651_v48 = vld [vmem:[%s5234_s3 + $0x2] ss:$0 sm:$0xff]  ;;  %s4543_s7 = smov 112   ;;  %s4544_s8 = smov 120   ;;  %vm1215_vm8 = vcmask 195584   ;;  %vm4949_vm13 = vmpackc.low %vm180_vm6, %vm180_vm6 }
   0x6   :  { %4187 = vmatprep.subr.bf16.mxu1 %v4186_v19  ;;  %s4545_s9 = smov 72   ;;  %s4546_s10 = smov 104  }
   0x7   :  { %38 = vadd.xlane.f32.xlu0 %v37_v3  ;;  %4189 = vmatpush3.bf16.msra.mxu1 %v4186_v19  ;;  %v4745_v19 = vld [vmem:[%s5233_s2 + $0x8] sm:$0xff]  ;;  %s4547_s27 = smov 64   ;;  %s4549_s28 = smov 56  }
   0x8   :  { %4191 = vmatprep.subr.bf16.mxu1 %v4190_v21  ;;  %s4550_s29 = smov 40   ;;  %s4551_s30 = smov 32  }
   0x9   :  { %s4552_s11 = smov 16   ;;  %s4553_s12 = smov 8  }
   0xa   :  { %s4554_s13 = smov 24  }
   0xb   :  { %4193 = vmatpush3.bf16.msra.mxu1 %v4190_v21  ;;  %v4750_v21 = vld [vmem:[%s5233_s2 + $0x20] sm:$0xff] }
   0xc   :  { %3917 = vmatprep.subr.mxu1 %v4539_v47 }
  0x1d   :  { %82 = vrot.lane.b32.xlu0 %v4600_v4, %s4538_s21 }
  0x90   :  { %v36_v5 = vpop.xlane.xlu0 %35 }
  0x91   :  { %v41_v6 = vmul.f32 0.03125, %v36_v5 }
  0x93   :  { %v43_v7 = vsub.f32 %v4586_v0, %v41_v6  ;;  %v4732_v6 = vld [vmem:[%s5233_s2] sm:$0xff] }
  0x94   :  { %v39_v8 = vpop.xlane.xlu0 %38 }
  0x95   :  { %v42_v9 = vmul.f32 0.03125, %v39_v8  ;;  %v45_v10 = vmul.f32 %v43_v7, %v43_v7 }
  0x97   :  { %v44_v11 = vsub.f32 %v4591_v1, %v42_v9  ;;  %v47_v12 = vsel %vm33_vm0, %v45_v10, 0.0 }
  0x98   :  { %48 = vadd.xlane.f32.xlu1 %v47_v12  ;;  %v4634_v40 = vpop.permute.xlu0 %82 }
  0x99   :  { %v46_v13 = vmul.f32 %v44_v11, %v44_v11 }
  0x9b   :  { %v50_v14 = vsel %vm33_vm0, %v46_v13, 0.0 }
  0x9c   :  { %51 = vadd.xlane.f32.xlu1 %v50_v14 }
 0x125   :  { %v49_v22 = vpop.xlane.xlu1 %48 }
 0x126   :  { %v53_v23 = vmul.f32 0.032258064, %v49_v22 }
 0x128   :  { %4426 = vrsqrt.f32 %v53_v23  ;;  %vm57_vm1 = vcmp.eq.f32.partialorder %v53_v23, inf  ;;  %v60_v28 = vand.u32 2147483648, %v53_v23  ;;  %vm59_vm2 = vcmp.eq.f32.partialorder %v53_v23, 0.0 }
 0x129   :  { %v52_v24 = vpop.xlane.xlu1 %51 }
 0x12a   :  { %v54_v25 = vmul.f32 0.032258064, %v52_v24 }
 0x12c   :  { %4428 = vrsqrt.f32 %v54_v25  ;;  %vm64_vm3 = vcmp.eq.f32.partialorder %v54_v25, inf  ;;  %v67_v34 = vand.u32 2147483648, %v54_v25  ;;  %vm66_vm4 = vcmp.eq.f32.partialorder %v54_v25, 0.0 }
 0x132   :  { %v4427_v26 = vpop.eup %4426 }
 0x133   :  { %v56_v27 = vmul.f32 %v4427_v26, %v53_v23 }
 0x135   :  { %v58_v29 = vsel %vm57_vm1, %v53_v23, %v56_v27 }
 0x136   :  { %v4429_v30 = vpop.eup %4428  ;;  %v61_v31 = vsel %vm59_vm2, %v60_v28, %v58_v29 }
 0x137   :  { %v63_v32 = vmul.f32 %v4429_v30, %v54_v25  ;;  %v69_v33 = vadd.f32 1e-06, %v61_v31  ;;  %v4760_v31 = vld [vmem:[%s5233_s2 + $0x18] sm:$0xff] }
 0x139   :  { %v65_v35 = vsel %vm64_vm3, %v54_v25, %v63_v32  ;;  %4430 = vrcp.f32 %v69_v33  ;;  %vm3593_vm3 = vcmask 523264  }
 0x13a   :  { %v68_v36 = vsel %vm66_vm4, %v67_v34, %v65_v35  ;;  %v4766_v35 = vld [vmem:[%s5233_s2 + $0x28] sm:$0xff] }
 0x13b   :  { %v70_v37 = vadd.f32 1e-06, %v68_v36 }
 0x13d   :  { %4432 = vrcp.f32 %v70_v37 }
 0x143   :  { %v4431_v38 = vpop.eup %4430 }
 0x144   :  { %v73_v39 = vmul.f32 %v4431_v38, %v43_v7  ;;  %v4737_v7 = vld [vmem:[%s5233_s2 + $0x10] sm:$0xff] }
 0x146   :  { %v79_v41 = vmul.f32 %v4600_v4, %v73_v39 }
 0x147   :  { %v4433_v42 = vpop.eup %4432 }
 0x148   :  { %v85_v43 = vadd.f32 %v4634_v40, %v79_v41  ;;  %v74_v44 = vmul.f32 %v4433_v42, %v44_v11  ;;  %v4773_v41 = vld [vmem:[%s5233_s2 + $0x30] sm:$0xff]  ;;  %v4778_v42 = vld [vmem:[%s5233_s2 + $0x38] sm:$0xff]  ;;  %s4548_s2 = smov 48  }
 0x14a   :  { %3914 = vmatprep.mubr.msk.f32.mxu1 %vm33_vm0, %v85_v43  ;;  %v80_v45 = vmul.f32 %v4600_v4, %v74_v44 }
 0x14c   :  { %v86_v46 = vadd.f32 %v4634_v40, %v80_v45 }
 0x14e   :  { %3915 = vmatmul.mubr.msk.f32.vlgmr.msra.gmra.mrb[0].mxu1 %vm33_vm0, %v86_v46 }
 0x14f   :  { %3919 = vmatprep.mubr.msk.f32.mxu1 %vm4540_vm5, %v4539_v47 }
 0x221   :  { %v3916_v49 = vpop.f32.mrb[0].mxu1 }
 0x222   :  { %v4654_v50 = vadd.f32 %v3916_v49, %v4651_v48  ;;  %v168_v51 = vpop.f32.mrb[1].mxu1 }
 0x223   :  { %v4661_v52 = vadd.f32 %v4651_v48, %v168_v51 }
 0x224   :  { %568 = vrot.lane.b32.xlu1 %v4654_v50, %s4541_s5  ;;  %490 = vrot.lane.b32.xlu0 %v4654_v50, %s4538_s21 }
 0x228   :  { %335 = vrot.lane.b32.xlu0 %v4661_v52, %s4542_s6  ;;  %178 = vrot.lane.b32.xlu1 %v4661_v52, %s4538_s21 }
 0x22c   :  { %333 = vrot.lane.b32.xlu0 %v4661_v52, %s4543_s7  ;;  %257 = vrot.lane.b32.xlu1 %v4661_v52, %s4541_s5 }
 0x230   :  { %566 = vrot.lane.b32.xlu0 %v4654_v50, %s4544_s8  ;;  %255 = vrot.lane.b32.xlu1 %v4661_v52, %s4544_s8 }
 0x234   :  { %724 = vrot.lane.b32.xlu0 %v4654_v50, %s4545_s9  ;;  %413 = vrot.lane.b32.xlu1 %v4661_v52, %s4545_s9 }
 0x238   :  { %722 = vrot.lane.b32.xlu0 %v4654_v50, %s4546_s10  ;;  %411 = vrot.lane.b32.xlu1 %v4661_v52, %s4546_s10 }
 0x23c   :  { %646 = vrot.lane.b32.xlu1 %v4654_v50, %s4542_s6 }
 0x240   :  { %644 = vrot.lane.b32.xlu1 %v4654_v50, %s4543_s7 }
 0x296   :  { %v569_v53 = vpop.permute.xlu1 %568  ;;  %v491_v54 = vpop.permute.xlu0 %490 }
 0x29a   :  { %v336_v55 = vpop.permute.xlu0 %335  ;;  %v179_v56 = vpop.permute.xlu1 %178 }
 0x29b   :  { %3918 = vmatpush3.xpose.msk.msra.mxu1 %vm180_vm6, %v179_v56  ;;  %3928 = vmatpush3.xpose.msk.msra.mxu0 %vm180_vm6, %v336_v55 }
 0x29c   :  { %3937 = vmatprep.subr.mxu0 %v4539_v47  ;;  %3922 = vmatprep.subr.mxu1 %v4539_v47 }
 0x29e   :  { %v334_v57 = vpop.permute.xlu0 %333  ;;  %3920 = vmatmul.mubr.msk.f32.vlgmr.msra.gmra.mrb[2].mxu1 %vm180_vm6, %v4661_v52  ;;  %v258_v58 = vpop.permute.xlu1 %257 }
 0x29f   :  { %3923 = vmatpush3.xpose.msk.msra.mxu1 %vm180_vm6, %v258_v58  ;;  %3930 = vmatmul.mubr.msk.f32.vlgmr.msra.gmra.mrb[0].mxu0 %vm180_vm6, %v334_v57 }
 0x2a0   :  { %3938 = vmatpush3.xpose.msk.msra.mxu0 %vm180_vm6, %v491_v54  ;;  %3939 = vmatprep.mubr.msk.f32.mxu0 %vm4540_vm5, %v4539_v47 }
 0x2a1   :  { %3924 = vmatprep.mubr.msk.f32.mxu1 %vm4540_vm5, %v4539_v47  ;;  %3932 = vmatprep.subr.mxu1 %v4539_v47 }
 0x2a2   :  { %v256_v59 = vpop.permute.xlu1 %255  ;;  %3947 = vmatprep.subr.mxu0 %v4539_v47  ;;  %v567_v60 = vpop.permute.xlu0 %566 }
 0x2a3   :  { %3925 = vmatmul.mubr.msk.f32.vlgmr.msra.gmra.mrb[4].mxu1 %vm180_vm6, %v256_v59  ;;  %3940 = vmatmul.mubr.msk.f32.vlgmr.msra.gmra.mrb[2].mxu0 %vm180_vm6, %v4654_v50 }
 0x2a4   :  { %3934 = vmatprep.mubr.msk.f32.mxu1 %vm4540_vm5, %v4539_v47  ;;  %3949 = vmatprep.mubr.msk.f32.mxu0 %vm4540_vm5, %v4539_v47 }
 0x2a6   :  { %v414_v61 = vpop.permute.xlu1 %413  ;;  %v725_v63 = vpop.permute.xlu0 %724 }
 0x2a7   :  { %3933 = vmatpush3.xpose.msk.msra.mxu1 %vm180_vm6, %v414_v61 }
 0x2a8   :  { %3942 = vmatprep.subr.mxu1 %v4539_v47 }
 0x2aa   :  { %v412_v62 = vpop.permute.xlu1 %411  ;;  %v723_v3 = vpop.permute.xlu0 %722 }
 0x2ab   :  { %3935 = vmatmul.mubr.msk.f32.vlgmr.msra.gmra.mrb[6].mxu1 %vm180_vm6, %v412_v62 }
 0x2ac   :  { %3943 = vmatpush3.xpose.msk.msra.mxu1 %vm180_vm6, %v569_v53  ;;  %3944 = vmatprep.mubr.msk.f32.mxu1 %vm4540_vm5, %v4539_v47 }
 0x2ad   :  { %3952 = vmatprep.subr.mxu1 %v4539_v47 }
 0x2ae   :  { %v647_v2 = vpop.permute.xlu1 %646 }
 0x2af   :  { %3945 = vmatmul.mubr.msk.f32.vlgmr.msra.gmra.mrb[8].mxu1 %vm180_vm6, %v567_v60  ;;  %3948 = vmatpush3.xpose.msk.msra.mxu0 %vm180_vm6, %v647_v2 }
 0x2b0   :  { %3953 = vmatpush3.xpose.msk.msra.mxu1 %vm180_vm6, %v725_v63  ;;  %3954 = vmatprep.mubr.msk.f32.mxu1 %vm4540_vm5, %v4539_v47 }
 0x2b1   :  { %3962 = vmatprep.subr.mxu1 %v4539_v47  ;;  %3957 = vmatprep.subr.mxu0 %v4539_v47 }
 0x2b2   :  { %v645_v5 = vpop.permute.xlu1 %644 }
 0x2b3   :  { %3950 = vmatmul.mubr.msk.f32.vlgmr.msra.gmra.mrb[4].mxu0 %vm180_vm6, %v645_v5  ;;  %3955 = vmatmul.mubr.msk.f32.vlgmr.msra.gmra.mrb[10].mxu1 %vm180_vm6, %v723_v3 }
 0x2b4   :  { %3959 = vmatprep.mubr.msk.f32.mxu0 %vm4540_vm5, %v4539_v47  ;;  %3964 = vmatprep.mubr.msk.f32.mxu1 %vm4540_vm5, %v4539_v47 }
 0x371   :  { %v251_v8 = vpop.f32.mrb[2].mxu1 }
 0x372   :  { %v800_v9 = vadd.f32 %v251_v8, %v4732_v6  ;;  %v3921_v10 = vpop.f32.mrb[3].mxu1  ;;  %v407_v11 = vpop.f32.mrb[0].mxu0 }
 0x373   :  { %v802_v12 = vadd.f32 %v407_v11, %v4737_v7  ;;  %v3931_v13 = vpop.f32.mrb[1].mxu0 }
 0x374   :  { %v808_v14 = vsel %vm180_vm6, %v800_v9, -inf }
 0x375   :  { %809 = vmax.xlane.f32.xlu1 %v808_v14  ;;  %v814_v22 = vsel %vm180_vm6, %v802_v12, -inf }
 0x376   :  { %815 = vmax.xlane.f32.xlu0 %v814_v22  ;;  %v329_v23 = vpop.f32.mrb[4].mxu1  ;;  %v562_v24 = vpop.f32.mrb[2].mxu0 }
 0x377   :  { %v801_v25 = vadd.f32 %v329_v23, %v4745_v19  ;;  %v804_v26 = vadd.f32 %v562_v24, %v4750_v21  ;;  %v3926_v27 = vpop.f32.mrb[5].mxu1  ;;  %v3941_v28 = vpop.f32.mrb[3].mxu0 }
 0x379   :  { %v820_v29 = vsel %vm180_vm6, %v804_v26, -inf  ;;  %v811_v30 = vsel %vm180_vm6, %v801_v25, -inf }
 0x37a   :  { %821 = vmax.xlane.f32.xlu1 %v820_v29  ;;  %812 = vmax.xlane.f32.xlu0 %v811_v30 }
 0x37e   :  { %v485_v32 = vpop.f32.mrb[6].mxu1 }
 0x37f   :  { %v803_v33 = vadd.f32 %v485_v32, %v4760_v31  ;;  %v3936_v34 = vpop.f32.mrb[7].mxu1 }
 0x381   :  { %v817_v36 = vsel %vm180_vm6, %v803_v33, -inf }
 0x382   :  { %818 = vmax.xlane.f32.xlu0 %v817_v36  ;;  %v640_v37 = vpop.f32.mrb[8].mxu1 }
 0x383   :  { %v805_v38 = vadd.f32 %v640_v37, %v4766_v35  ;;  %v3946_v39 = vpop.f32.mrb[9].mxu1 }
 0x385   :  { %v823_v43 = vsel %vm180_vm6, %v805_v38, -inf }
 0x386   :  { %824 = vmax.xlane.f32.xlu0 %v823_v43  ;;  %v718_v44 = vpop.f32.mrb[4].mxu0  ;;  %v796_v45 = vpop.f32.mrb[10].mxu1 }
 0x387   :  { %v806_v46 = vadd.f32 %v718_v44, %v4773_v41  ;;  %v807_v49 = vadd.f32 %v796_v45, %v4778_v42  ;;  %v3951_v51 = vpop.f32.mrb[5].mxu0  ;;  %v3956_v53 = vpop.f32.mrb[11].mxu1 }
 0x389   :  { %v829_v54 = vsel %vm180_vm6, %v807_v49, -inf  ;;  %v826_v55 = vsel %vm180_vm6, %v806_v46, -inf }
 0x38a   :  { %830 = vmax.xlane.f32.xlu0 %v829_v54  ;;  %827 = vmax.xlane.f32.xlu1 %v826_v55 }
 0x39b   :  { %896 = vrot.lane.b32.xlu1 %v4661_v52, %s4547_s27 }
 0x39f   :  { %1048 = vrot.lane.b32.xlu1 %v4661_v52, %s4548_s2 }
 0x3a0   :  { %972 = vrot.lane.b32.xlu0 %v4661_v52, %s4549_s28 }
 0x3a3   :  { %1124 = vrot.lane.b32.xlu1 %v4661_v52, %s4550_s29 }
 0x3a4   :  { %1293 = vrot.lane.b32.xlu0 %v4654_v50, %s4549_s28 }
 0x3a7   :  { %1217 = vrot.lane.b32.xlu1 %v4654_v50, %s4547_s27 }
 0x402   :  { %v810_v56 = vpop.xlane.xlu1 %809 }
 0x403   :  { %v832_v57 = vsub.f32 %v800_v9, %v810_v56  ;;  %v816_v58 = vpop.xlane.xlu0 %815 }
 0x404   :  { %v834_v59 = vsub.f32 %v802_v12, %v816_v58 }
 0x405   :  { %v840_v60 = vmul.f32 1.442695, %v832_v57 }
 0x406   :  { %v844_v61 = vmul.f32 1.442695, %v834_v59 }
 0x407   :  { %4434 = vpow2.f32 %v840_v60  ;;  %v813_v62 = vpop.xlane.xlu0 %812  ;;  %v822_v63 = vpop.xlane.xlu1 %821 }
 0x408   :  { %v833_v2 = vsub.f32 %v801_v25, %v813_v62  ;;  %v836_v3 = vsub.f32 %v804_v26, %v822_v63  ;;  %4436 = vpow2.f32 %v844_v61 }
 0x40a   :  { %v842_v5 = vmul.f32 1.442695, %v833_v2  ;;  %v848_v8 = vmul.f32 1.442695, %v836_v3 }
 0x40c   :  { %4438 = vpow2.f32 %v842_v5 }
 0x40d   :  { %4440 = vpow2.f32 %v848_v8 }
 0x40f   :  { %v819_v52 = vpop.xlane.xlu0 %818 }
 0x410   :  { %v835_v10 = vsub.f32 %v803_v33, %v819_v52 }
 0x411   :  { %v4435_v11 = vpop.eup %4434 }
 0x412   :  { %v846_v13 = vmul.f32 1.442695, %v835_v10  ;;  %v856_v9 = vsel %vm180_vm6, %v4435_v11, 0.0  ;;  %v4796_v14 = vpop.eup %4436 }
 0x413   :  { %v825_v12 = vpop.xlane.xlu0 %824  ;;  %857 = vadd.xlane.f32.xlu1 %v856_v9  ;;  %v862_v25 = vsel %vm180_vm6, %v4796_v14, 0.0 }
 0x414   :  { %4442 = vpow2.f32 %v846_v13  ;;  %v837_v22 = vsub.f32 %v805_v38, %v825_v12 }
 0x416   :  { %v4439_v23 = vpop.eup %4438  ;;  %v850_v24 = vmul.f32 1.442695, %v837_v22 }
 0x417   :  { %v4800_v26 = vpop.eup %4440  ;;  %v831_v27 = vpop.xlane.xlu0 %830  ;;  %863 = vadd.xlane.f32.xlu1 %v862_v25  ;;  %v859_v29 = vsel %vm180_vm6, %v4439_v23, 0.0 }
 0x418   :  { %v828_v28 = vpop.xlane.xlu1 %827  ;;  %4444 = vpow2.f32 %v850_v24  ;;  %v839_v30 = vsub.f32 %v807_v49, %v831_v27  ;;  %860 = vadd.xlane.f32.xlu0 %v859_v29  ;;  %v868_v36 = vsel %vm180_vm6, %v4800_v26, 0.0 }
 0x419   :  { %v838_v32 = vsub.f32 %v806_v46, %v828_v28 }
 0x41a   :  { %v854_v33 = vmul.f32 1.442695, %v839_v30  ;;  %v4331_v30 = vpack.i.bf16 %v4630_v20, %v4621_v17 }
 0x41b   :  { %v852_v34 = vmul.f32 1.442695, %v838_v32  ;;  %v973_v37 = vpop.permute.xlu0 %972  ;;  %869 = vadd.xlane.f32.xlu1 %v868_v36 }
 0x41c   :  { %v897_v38 = vpop.permute.xlu1 %896  ;;  %4446 = vpow2.f32 %v854_v33  ;;  %3963 = vmatpush3.msra.mxu1 %v973_v37 }
 0x41d   :  { %3958 = vmatpush3.msra.mxu0 %v897_v38  ;;  %4448 = vpow2.f32 %v852_v34  ;;  %3972 = vmatprep.subr.mxu1 %v4539_v47 }
 0x41e   :  { %3967 = vmatprep.subr.mxu0 %v4539_v47  ;;  %v4443_v39 = vpop.eup %4442 }
 0x41f   :  { %v865_v43 = vsel %vm180_vm6, %v4443_v39, 0.0  ;;  %v1294_v58 = vpop.permute.xlu0 %1293 }
 0x420   :  { %866 = vadd.xlane.f32.xlu0 %v865_v43  ;;  %v1049_v54 = vpop.permute.xlu1 %1048 }
 0x422   :  { %v4445_v44 = vpop.eup %4444 }
 0x423   :  { %v871_v45 = vsel %vm180_vm6, %v4445_v44, 0.0 }
 0x424   :  { %872 = vadd.xlane.f32.xlu0 %v871_v45  ;;  %v1125_v55 = vpop.permute.xlu1 %1124 }
 0x426   :  { %v4809_v46 = vpop.eup %4446 }
 0x427   :  { %v4811_v49 = vpop.eup %4448  ;;  %v877_v51 = vsel %vm180_vm6, %v4809_v46, 0.0 }
 0x428   :  { %878 = vadd.xlane.f32.xlu0 %v877_v51  ;;  %v874_v53 = vsel %vm180_vm6, %v4811_v49, 0.0  ;;  %v1218_v56 = vpop.permute.xlu1 %1217 }
 0x429   :  { %875 = vadd.xlane.f32.xlu1 %v874_v53 }
 0x43a   :  { %1369 = vrot.lane.b32.xlu1 %v4654_v50, %s4548_s2 }
 0x43e   :  { %1445 = vrot.lane.b32.xlu0 %v4654_v50, %s4550_s29  ;;  %4327 = vrot.lane.b32.xlu1 %v4326_v18, %s4551_s30 }
 0x442   :  { %4332 = vrot.lane.b32.xlu0 %v4331_v30, %s4551_s30 }
 0x4a0   :  { %v858_v57 = vpop.xlane.xlu1 %857 }
 0x4a1   :  { %4450 = vrcp.f32 %v858_v57 }
 0x4a4   :  { %v864_v59 = vpop.xlane.xlu1 %863 }
 0x4a5   :  { %4452 = vrcp.f32 %v864_v59  ;;  %v861_v60 = vpop.xlane.xlu0 %860 }
 0x4a6   :  { %4454 = vrcp.f32 %v861_v60 }
 0x4a8   :  { %v870_v61 = vpop.xlane.xlu1 %869 }
 0x4a9   :  { %4456 = vrcp.f32 %v870_v61 }
 0x4ab   :  { %v4451_v62 = vpop.eup %4450 }
 0x4ac   :  { %v888_v63 = vmul.f32 %v4451_v62, %v4435_v11 }
 0x4ad   :  { %v867_v2 = vpop.xlane.xlu0 %866 }
 0x4ae   :  { %4458 = vrcp.f32 %v867_v2  ;;  %3960 = vmatmul.mubr.msk.f32.vlgmr.msra.gmra.mrb[6].mxu0 %vm180_vm6, %v888_v63 }
 0x4af   :  { %v4453_v3 = vpop.eup %4452  ;;  %3968 = vmatpush3.msra.mxu0 %v1049_v54  ;;  %3969 = vmatprep.mubr.msk.f32.mxu0 %vm4540_vm5, %v4539_v47 }
 0x4b0   :  { %v4455_v50 = vpop.eup %4454  ;;  %v890_v5 = vmul.f32 %v4453_v3, %v4796_v14  ;;  %3977 = vmatprep.subr.mxu0 %v4539_v47 }
 0x4b1   :  { %v889_v8 = vmul.f32 %v4455_v50, %v4439_v23  ;;  %v873_v52 = vpop.xlane.xlu0 %872 }
 0x4b2   :  { %4460 = vrcp.f32 %v873_v52  ;;  %3970 = vmatmul.mubr.msk.f32.vlgmr.msra.gmra.mrb[8].mxu0 %vm180_vm6, %v890_v5 }
 0x4b3   :  { %v4457_v10 = vpop.eup %4456  ;;  %3978 = vmatpush3.msra.mxu0 %v1218_v56  ;;  %3965 = vmatmul.mubr.msk.f32.vlgmr.msra.gmra.mrb[12].mxu1 %vm180_vm6, %v889_v8 }
 0x4b4   :  { %v892_v11 = vmul.f32 %v4457_v10, %v4800_v26  ;;  %3973 = vmatpush3.msra.mxu1 %v1125_v55  ;;  %3979 = vmatprep.mubr.msk.f32.mxu0 %vm4540_vm5, %v4539_v47 }
 0x4b5   :  { %v879_v13 = vpop.xlane.xlu0 %878  ;;  %3987 = vmatprep.subr.mxu0 %v4539_v47  ;;  %3974 = vmatprep.mubr.msk.f32.mxu1 %vm4540_vm5, %v4539_v47 }
 0x4b6   :  { %4462 = vrcp.f32 %v879_v13  ;;  %v876_v9 = vpop.xlane.xlu1 %875  ;;  %3980 = vmatmul.mubr.msk.f32.vlgmr.msra.gmra.mrb[10].mxu0 %vm180_vm6, %v892_v11  ;;  %3982 = vmatprep.subr.mxu1 %v4539_v47 }
 0x4b7   :  { %4464 = vrcp.f32 %v876_v9  ;;  %3989 = vmatprep.mubr.msk.f32.mxu0 %vm4540_vm5, %v4539_v47 }
 0x4b8   :  { %v4459_v14 = vpop.eup %4458 }
 0x4b9   :  { %v891_v12 = vmul.f32 %v4459_v14, %v4443_v39  ;;  %v1446_v25 = vpop.permute.xlu0 %1445 }
 0x4ba   :  { %v1370_v22 = vpop.permute.xlu1 %1369 }
 0x4bb   :  { %3988 = vmatpush3.msra.mxu0 %v1370_v22  ;;  %3975 = vmatmul.mubr.msk.f32.vlgmr.msra.gmra.mrb[14].mxu1 %vm180_vm6, %v891_v12 }
 0x4bc   :  { %v4461_v23 = vpop.eup %4460  ;;  %3983 = vmatpush3.msra.mxu1 %v1294_v58  ;;  %3984 = vmatprep.mubr.msk.f32.mxu1 %vm4540_vm5, %v4539_v47 }
 0x4bd   :  { %v893_v24 = vmul.f32 %v4461_v23, %v4445_v44  ;;  %3992 = vmatprep.subr.mxu1 %v4539_v47  ;;  %v4333_v33 = vpop.permute.xlu0 %4332 }
 0x4be   :  { %v4328_v32 = vpop.permute.xlu1 %4327  ;;  %v4335_v37 = vunpack.i.h.bf16 %v4333_v33  ;;  %v4334_v38 = vunpack.i.l.bf16 %v4333_v33 }
 0x4bf   :  { %3985 = vmatmul.mubr.msk.f32.vlgmr.msra.gmra.mrb[16].mxu1 %vm180_vm6, %v893_v24  ;;  %v4330_v34 = vunpack.i.h.bf16 %v4328_v32  ;;  %v4329_v36 = vunpack.i.l.bf16 %v4328_v32 }
 0x4c0   :  { %v4463_v26 = vpop.eup %4462  ;;  %3993 = vmatpush3.msra.mxu1 %v1446_v25  ;;  %3994 = vmatprep.mubr.msk.f32.mxu1 %vm4540_vm5, %v4539_v47  ;;  %v4198_v43 = vpack.c.bf16 %v4335_v37, %v4334_v38 }
 0x4c1   :  { %v4465_v27 = vpop.eup %4464  ;;  %v895_v28 = vmul.f32 %v4463_v26, %v4809_v46  ;;  %v4194_v39 = vpack.c.bf16 %v4330_v34, %v4329_v36 }
 0x4c2   :  { %v894_v29 = vmul.f32 %v4465_v27, %v4811_v49 }
 0x4c3   :  { %3995 = vmatmul.mubr.msk.f32.vlgmr.msra.gmra.mrb[18].mxu1 %vm180_vm6, %v895_v28  ;;  %4195 = vmatprep.subr.bf16.mxu0 %v4194_v39 }
 0x4c4   :  { %3990 = vmatmul.mubr.msk.f32.vlgmr.msra.gmra.mrb[12].mxu0 %vm180_vm6, %v894_v29 }
 0x4c5   :  { %4197 = vmatpush3.bf16.msra.mxu0 %v4194_v39 }
 0x4c6   :  { %4199 = vmatprep.subr.bf16.mxu0 %v4198_v43 }
 0x4c9   :  { %4201 = vmatpush3.bf16.msra.mxu0 %v4198_v43 }
 0x581   :  { %v968_v17 = vpop.f32.mrb[6].mxu0 }
 0x582   :  { %v3961_v20 = vpop.f32.mrb[7].mxu0 }
 0x585   :  { %v1120_v44 = vpop.f32.mrb[8].mxu0 }
 0x586   :  { %v1044_v45 = vpop.f32.mrb[12].mxu1  ;;  %1205 = vrot.lane.b32.xlu0 %v1120_v44, %s4552_s11  ;;  %v3971_v15 = vpop.f32.mrb[9].mxu0 }
 0x587   :  { %v3966_v16 = vpop.f32.mrb[13].mxu1  ;;  %1201 = vrot.lane.b32.xlu1 %v1044_v45, %s4553_s12 }
 0x589   :  { %v1289_v18 = vpop.f32.mrb[10].mxu0 }
 0x58a   :  { %v3981_v46 = vpop.f32.mrb[11].mxu0 }
 0x58e   :  { %v1196_v49 = vpop.f32.mrb[14].mxu1 }
 0x58f   :  { %v3976_v51 = vpop.f32.mrb[15].mxu1  ;;  %1209 = vrot.lane.b32.xlu0 %v1196_v49, %s4554_s13 }
 0x592   :  { %v1365_v53 = vpop.f32.mrb[16].mxu1 }
 0x593   :  { %1522 = vrot.lane.b32.xlu1 %v1365_v53, %s4553_s12  ;;  %v3986_v54 = vpop.f32.mrb[17].mxu1 }
 0x596   :  { %v1517_v55 = vpop.f32.mrb[18].mxu1 }
 0x597   :  { %v1441_v56 = vpop.f32.mrb[12].mxu0  ;;  %v3996_v57 = vpop.f32.mrb[19].mxu1  ;;  %1530 = vrot.lane.b32.xlu0 %v1517_v55, %s4554_s13 }
 0x598   :  { %1526 = vrot.lane.b32.xlu1 %v1441_v56, %s4552_s11  ;;  %v3991_v58 = vpop.f32.mrb[13].mxu0  ;;  %v1691_v56 = vld [vmem:[%s5234_s3 + $0x28] sm:$0xff]  ;;  %v1692_v57 = vld [vmem:[%s5234_s3 + $0x30] sm:$0xff] }
 0x59c   :  { %1553 = vrot.lane.b32.xlu1 %v4651_v48, %s4551_s30 }
 0x5f8   :  { %v1206_v60 = vpop.permute.xlu0 %1205 }
 0x5f9   :  { %v1202_v59 = vpop.permute.xlu1 %1201 }
 0x5fa   :  { %v1212_v61 = vsel %vm180_vm6, %v968_v17, %v1202_v59  ;;  %v4894_v59 = vpack.i.bf16 %v1692_v57, %v1691_v56 }
 0x5fb   :  { %v1214_v63 = vsel %vm1213_vm7, %v1212_v61, %v1206_v60  ;;  %v20_v60 = vld [vmem:[%s5232_s1] sm:$0xff]  ;;  %v1693_v61 = vld [vmem:[%s5234_s3 + $0x38] sm:$0xff] }
 0x601   :  { %v1210_v62 = vpop.permute.xlu0 %1209 }
 0x602   :  { %v1216_v2 = vsel %vm1215_vm8, %v1214_v63, %v1210_v62  ;;  %v1694_v62 = vld [vmem:[%s5234_s3 + $0x40] sm:$0xff] }
 0x603   :  { %4005 = vmatprep.mubr.msk.f32.mxu0 %vm33_vm0, %v1216_v2  ;;  %v4908_v63 = vpack.i.bf16 %v1694_v62, %v1693_v61  ;;  %v4202_v2 = vpack.c.bf16 %v1692_v57, %v1691_v56 }
 0x605   :  { %v1523_v3 = vpop.permute.xlu1 %1522  ;;  %4203 = vmatprep.subr.bf16.mxu1 %v4202_v2 }
 0x606   :  { %v1533_v5 = vsel %vm180_vm6, %v1289_v18, %v1523_v3  ;;  %4205 = vmatpush3.bf16.msra.mxu1 %v4202_v2  ;;  %v4206_v3 = vpack.c.bf16 %v1694_v62, %v1693_v61 }
 0x608   :  { %4207 = vmatprep.subr.bf16.mxu1 %v4206_v3 }
 0x609   :  { %v1531_v50 = vpop.permute.xlu0 %1530 }
 0x60a   :  { %v1527_v8 = vpop.permute.xlu1 %1526  ;;  %4209 = vmatpush3.bf16.msra.mxu1 %v4206_v3 }
 0x60b   :  { %v1534_v48 = vsel %vm1213_vm7, %v1533_v5, %v1527_v8 }
 0x60c   :  { %v1535_v52 = vsel %vm1215_vm8, %v1534_v48, %v1531_v50 }
 0x60d   :  { %4006 = vmatmul.mubr.msk.f32.vlgmr.msra.gmra.mrb[14].mxu0 %vm33_vm0, %v1535_v52 }
 0x60e   :  { %v1554_v10 = vpop.permute.xlu1 %1553  ;;  %4027 = vmatprep.mubr.msk.f32.mxu0 %vm33_vm0, %v20_v60 }
 0x6e0   :  { %v4007_v11 = vpop.f32.mrb[14].mxu0 }
 0x6e1   :  { %v1634_v13 = vadd.f32 %v4007_v11, %v1554_v10  ;;  %v1628_v9 = vpop.f32.mrb[15].mxu0 }
 0x6e2   :  { %v1629_v14 = vadd.f32 %v1628_v9, %v1554_v10  ;;  %v4919_v10 = vld [vmem:[%s5234_s3 + $0x3] ss:$0 sm:$0xff] }
 0x6e3   :  { %v4873_v12 = vadd.f32 %v1634_v13, %v4591_v1 }
 0x6e4   :  { %v4876_v22 = vadd.f32 %v1629_v14, %v4586_v0 }
 0x6e5   :  { %v1642_v23 = vsel %vm33_vm0, %v4873_v12, 0.0 }
 0x6e6   :  { %1643 = vadd.xlane.f32.xlu1 %v1642_v23  ;;  %v1639_v24 = vsel %vm33_vm0, %v4876_v22, 0.0 }
 0x6e7   :  { %1640 = vadd.xlane.f32.xlu0 %v1639_v24 }
 0x773   :  { %v1644_v25 = vpop.xlane.xlu1 %1643 }
 0x774   :  { %v1646_v26 = vmul.f32 0.03125, %v1644_v25  ;;  %v1641_v27 = vpop.xlane.xlu0 %1640 }
 0x775   :  { %v1645_v28 = vmul.f32 0.03125, %v1641_v27  ;;  %v22_v27 = vld [vmem:[%s5232_s1 + $0x10] sm:$0xff] }
 0x776   :  { %v1648_v29 = vsub.f32 %v4873_v12, %v1646_v26 }
 0x777   :  { %v1647_v1 = vsub.f32 %v4876_v22, %v1645_v28  ;;  %v23_v28 = vld [vmem:[%s5232_s1 + $0x18] sm:$0xff] }
 0x778   :  { %v1650_v32 = vmul.f32 %v1648_v29, %v1648_v29 }
 0x779   :  { %v1649_v30 = vmul.f32 %v1647_v1, %v1647_v1 }
 0x77a   :  { %v1654_v33 = vsel %vm33_vm0, %v1650_v32, 0.0 }
 0x77b   :  { %v1651_v0 = vsel %vm33_vm0, %v1649_v30, 0.0 }
 0x77c   :  { %1652 = vadd.xlane.f32.xlu0 %v1651_v0 }
 0x780   :  { %1655 = vadd.xlane.f32.xlu0 %v1654_v33 }
 0x809   :  { %v1653_v34 = vpop.xlane.xlu0 %1652 }
 0x80a   :  { %v1657_v36 = vmul.f32 0.032258064, %v1653_v34 }
 0x80c   :  { %4466 = vrsqrt.f32 %v1657_v36  ;;  %vm1661_vm9 = vcmp.eq.f32.partialorder %v1657_v36, inf  ;;  %v1664_v17 = vand.u32 2147483648, %v1657_v36  ;;  %vm1663_vm10 = vcmp.eq.f32.partialorder %v1657_v36, 0.0 }
 0x80d   :  { %v1656_v37 = vpop.xlane.xlu0 %1655 }
 0x80e   :  { %v1658_v38 = vmul.f32 0.032258064, %v1656_v37 }
 0x810   :  { %4468 = vrsqrt.f32 %v1658_v38  ;;  %vm1668_vm11 = vcmp.eq.f32.partialorder %v1658_v38, inf  ;;  %v1671_v18 = vand.u32 2147483648, %v1658_v38  ;;  %vm1670_vm12 = vcmp.eq.f32.partialorder %v1658_v38, 0.0 }
 0x816   :  { %v4467_v39 = vpop.eup %4466 }
 0x817   :  { %v1660_v43 = vmul.f32 %v4467_v39, %v1657_v36 }
 0x819   :  { %v1662_v20 = vsel %vm1661_vm9, %v1657_v36, %v1660_v43 }
 0x81a   :  { %v4469_v44 = vpop.eup %4468  ;;  %v1665_v45 = vsel %vm1663_vm10, %v1664_v17, %v1662_v20 }
 0x81b   :  { %v1667_v15 = vmul.f32 %v4469_v44, %v1658_v38  ;;  %v1673_v16 = vadd.f32 1e-06, %v1665_v45 }
 0x81d   :  { %4470 = vrcp.f32 %v1673_v16  ;;  %v1669_v46 = vsel %vm1668_vm11, %v1658_v38, %v1667_v15 }
 0x81e   :  { %v1672_v49 = vsel %vm1670_vm12, %v1671_v18, %v1669_v46 }
 0x81f   :  { %v1674_v51 = vadd.f32 1e-06, %v1672_v49 }
 0x821   :  { %4472 = vrcp.f32 %v1674_v51 }
 0x827   :  { %v4471_v53 = vpop.eup %4470 }
 0x828   :  { %v1677_v54 = vmul.f32 %v4471_v53, %v1647_v1 }
 0x82a   :  { %1681 = vrot.lane.b32.xlu0 %v1677_v54, %s4547_s27 }
 0x82b   :  { %v4473_v55 = vpop.eup %4472 }
 0x82c   :  { %v1678_v58 = vmul.f32 %v4473_v55, %v1648_v29  ;;  %v4555_v29 = vmov 0.0|0.0  }
 0x82d   :  { %4218 = vmatprep.subr.bf16.mxu1 %v4555_v29 }
 0x82e   :  { %1683 = vrot.lane.b32.xlu1 %v1678_v58, %s4547_s27 }
 0x832   :  { %4337 = vrot.lane.b32.xlu1 %v4894_v59, %s4538_s21 }
 0x836   :  { %4342 = vrot.lane.b32.xlu1 %v4908_v63, %s4538_s21 }
 0x89c   :  { %v1682_v50 = vpop.permute.xlu0 %1681 }
 0x89d   :  { %v1687_v5 = vmul.f32 %v4600_v4, %v1682_v50 }
 0x89f   :  { %v1689_v8 = vadd.f32 %v1687_v5, %v4634_v40 }
 0x8a0   :  { %v1684_v48 = vpop.permute.xlu1 %1683 }
 0x8a1   :  { %v1688_v52 = vmul.f32 %v4600_v4, %v1684_v48  ;;  %1702 = vrot.lane.b32.xlu0 %v1689_v8, %s4547_s27 }
 0x8a3   :  { %v1690_v11 = vadd.f32 %v1688_v52, %v4634_v40  ;;  %v21_v40 = vld [vmem:[%s5232_s1 + $0x8] sm:$0xff] }
 0x8a4   :  { %v4338_v13 = vpop.permute.xlu1 %4337 }
 0x8a5   :  { %1704 = vrot.lane.b32.xlu1 %v1690_v11, %s4547_s27  ;;  %v4340_v9 = vunpack.i.h.bf16 %v4338_v13  ;;  %v4339_v14 = vunpack.i.l.bf16 %v4338_v13  ;;  %1802 = vrot.lane.b32.xlu0 %v4919_v10, %s4538_s21 }
 0x8a7   :  { %v4210_v23 = vpack.c.bf16 %v4340_v9, %v4339_v14 }
 0x8a8   :  { %v4343_v24 = vpop.permute.xlu1 %4342 }
 0x8a9   :  { %v4345_v4 = vunpack.i.h.bf16 %v4343_v24  ;;  %v4344_v25 = vunpack.i.l.bf16 %v4343_v24  ;;  %4211 = vmatprep.subr.bf16.mxu0 %v4210_v23 }
 0x8aa   :  { %4213 = vmatpush3.bf16.msra.mxu0 %v4210_v23 }
 0x8ab   :  { %v4214_v26 = vpack.c.bf16 %v4345_v4, %v4344_v25 }
 0x8ad   :  { %4215 = vmatprep.subr.bf16.mxu0 %v4214_v26 }
 0x8ae   :  { %4217 = vmatpush3.bf16.msra.mxu0 %v4214_v26 }
 0x8af   :  { %4222 = vmatprep.subr.bf16.mxu0 %v4555_v29 }
 0x8b1   :  { %4028 = vmatmul.mubr.msk.f32.vlgmr.msra.gmra.mrb[16].mxu0 %vm33_vm0, %v21_v40 }
 0x8b2   :  { %4030 = vmatprep.mubr.msk.f32.mxu0 %vm33_vm0, %v22_v27 }
 0x8b5   :  { %4031 = vmatmul.mubr.msk.f32.gmra.mrb[18].mxu0 %vm33_vm0, %v23_v28 }
 0x8b6   :  { %4044 = vmatprep.mubr.msk.f32.mxu0 %vm4540_vm5, %v4539_v47 }
 0x913   :  { %v1703_v1 = vpop.permute.xlu0 %1702 }
 0x914   :  { %4016 = vmatprep.mubr.msk.f32.mxu1 %vm33_vm0, %v1703_v1 }
 0x917   :  { %v1705_v30 = vpop.permute.xlu1 %1704  ;;  %v1803_v0 = vpop.permute.xlu0 %1802 }
 0x918   :  { %4017 = vmatmul.mubr.msk.f32.vlgmr.msra.gmra.mrb[20].mxu1 %vm33_vm0, %v1705_v30 }
 0x919   :  { %4037 = vmatprep.mubr.msk.f32.mxu1 %vm4540_vm5, %v4539_v47 }
 0x984   :  { %v4029_v32 = vpop.f32.mrb[16].mxu0 }
 0x985   :  { %v1883_v33 = vpop.f32.mrb[17].mxu0  ;;  %v1889_v34 = vadd.f32 %v4029_v32, %v1803_v0 }
 0x986   :  { %v1884_v36 = vadd.f32 %v1883_v33, %v1803_v0 }
 0x988   :  { %v4945_v37 = vpack.i.bf16 %v1889_v34, %v1884_v36  ;;  %v4032_v38 = vpop.f32.mrb[18].mxu0  ;;  %v4219_v39 = vpack.c.bf16 %v1889_v34, %v1884_v36 }
 0x989   :  { %v1899_v17 = vadd.f32 %v4032_v38, %v1803_v0  ;;  %v1893_v20 = vpop.f32.mrb[19].mxu0 }
 0x98a   :  { %4347 = vrot.lane.b32.xlu1 %v4945_v37, %s4544_s8  ;;  %v1894_v44 = vadd.f32 %v1893_v20, %v1803_v0  ;;  %4352 = vrot.lane.b32.xlu0 %v4945_v37, %s4543_s7 }
 0x98b   :  { %4221 = vmatpush3.bf16.xpose.msk.msra.mxu1 %vm4949_vm13, %v4219_v39 }
 0x98c   :  { %v4959_v45 = vpack.i.bf16 %v1899_v17, %v1894_v44  ;;  %4226 = vmatprep.subr.bf16.mxu1 %v4555_v29  ;;  %v4235_v15 = vpack.c.bf16 %v1899_v17, %v1894_v44 }
 0x98e   :  { %4357 = vrot.lane.b32.xlu1 %v4945_v37, %s4546_s10 }
 0x992   :  { %4362 = vrot.lane.b32.xlu1 %v4959_v45, %s4544_s8 }
 0x9eb   :  { %v4018_v16 = vpop.f32.mrb[20].mxu1 }
 0x9ec   :  { %v1776_v18 = vpop.f32.mrb[21].mxu1  ;;  %v1782_v49 = vadd.f32 %v4018_v16, %v4919_v10 }
 0x9ed   :  { %v1777_v46 = vadd.f32 %v4919_v10, %v1776_v18 }
 0x9ef   :  { %1981 = vrot.lane.b32.xlu0 %v1777_v46, %s4544_s8  ;;  %2145 = vrot.lane.b32.xlu1 %v1777_v46, %s4546_s10 }
 0x9f0   :  { %4038 = vmatmul.mubr.msk.f32.vlgmr.msra.gmra.mrb[22].mxu1 %vm180_vm6, %v1777_v46 }
 0x9f1   :  { %4051 = vmatprep.mubr.msk.f32.mxu1 %vm4540_vm5, %v4539_v47 }
 0x9f3   :  { %2063 = vrot.lane.b32.xlu0 %v1777_v46, %s4543_s7  ;;  %4372 = vrot.lane.b32.xlu1 %v4959_v45, %s4546_s10 }
 0x9f7   :  { %4367 = vrot.lane.b32.xlu0 %v4959_v45, %s4543_s7  ;;  %2388 = vrot.lane.b32.xlu1 %v1782_v49, %s4543_s7 }
 0x9fb   :  { %2306 = vrot.lane.b32.xlu0 %v1782_v49, %s4544_s8  ;;  %2560 = vrot.lane.b32.xlu1 %v4732_v6, %s4544_s8 }
 0x9fc   :  { %v4348_v51 = vpop.permute.xlu1 %4347  ;;  %v4353_v53 = vpop.permute.xlu0 %4352 }
 0x9fd   :  { %v4350_v54 = vunpack.i.h.bf16 %v4348_v51  ;;  %v4349_v55 = vunpack.i.l.bf16 %v4348_v51  ;;  %v4355_v56 = vunpack.i.h.bf16 %v4353_v53  ;;  %v4354_v57 = vunpack.i.l.bf16 %v4353_v53 }
 0x9ff   :  { %2470 = vrot.lane.b32.xlu0 %v1782_v49, %s4546_s10  ;;  %v4223_v58 = vpack.c.bf16 %v4350_v54, %v4349_v55  ;;  %v4227_v60 = vpack.c.bf16 %v4355_v56, %v4354_v57  ;;  %2564 = vrot.lane.b32.xlu1 %v4737_v7, %s4544_s8 }
 0xa00   :  { %v4358_v6 = vpop.permute.xlu1 %4357 }
 0xa01   :  { %4225 = vmatpush3.bf16.xpose.msk.msra.mxu0 %vm4949_vm13, %v4223_v58  ;;  %4229 = vmatpush3.bf16.xpose.msk.msra.mxu1 %vm4949_vm13, %v4227_v60  ;;  %v4360_v7 = vunpack.i.h.bf16 %v4358_v6  ;;  %v4359_v61 = vunpack.i.l.bf16 %v4358_v6 }
 0xa02   :  { %4230 = vmatprep.subr.bf16.mxu0 %v4555_v29  ;;  %4234 = vmatprep.subr.bf16.mxu1 %v4555_v29 }
 0xa03   :  { %2568 = vrot.lane.b32.xlu1 %v4750_v21, %s4544_s8  ;;  %2562 = vrot.lane.b32.xlu0 %v4745_v19, %s4544_s8  ;;  %v4231_v21 = vpack.c.bf16 %v4360_v7, %v4359_v61 }
 0xa04   :  { %v4363_v62 = vpop.permute.xlu1 %4362 }
 0xa07   :  { %2572 = vrot.lane.b32.xlu1 %v4773_v41, %s4544_s8  ;;  %2566 = vrot.lane.b32.xlu0 %v4760_v31, %s4544_s8  ;;  %v4365_v31 = vunpack.i.h.bf16 %v4363_v62 }
 0xa0b   :  { %2570 = vrot.lane.b32.xlu0 %v4766_v35, %s4544_s8  ;;  %v4364_v35 = vunpack.i.l.bf16 %v4363_v62 }
 0xa0f   :  { %2574 = vrot.lane.b32.xlu0 %v4778_v42, %s4544_s8  ;;  %v4239_v42 = vpack.c.bf16 %v4365_v31, %v4364_v35 }
 0xa61   :  { %v1982_v2 = vpop.permute.xlu0 %1981  ;;  %v2146_v19 = vpop.permute.xlu1 %2145 }
 0xa62   :  { %4045 = vmatmul.mubr.msk.f32.vlgmr.msra.gmra.mrb[20].mxu0 %vm180_vm6, %v1982_v2 }
 0xa63   :  { %4233 = vmatpush3.bf16.xpose.msk.msra.mxu0 %vm4949_vm13, %v4231_v21  ;;  %4058 = vmatprep.mubr.msk.f32.mxu0 %vm4540_vm5, %v4539_v47 }
 0xa64   :  { %4238 = vmatprep.subr.bf16.mxu0 %v4555_v29 }
 0xa65   :  { %v2064_v41 = vpop.permute.xlu0 %2063  ;;  %v4373_v50 = vpop.permute.xlu1 %4372 }
 0xa66   :  { %4052 = vmatmul.mubr.msk.f32.vlgmr.msra.gmra.mrb[24].mxu1 %vm180_vm6, %v2064_v41  ;;  %v4375_v52 = vunpack.i.h.bf16 %v4373_v50  ;;  %v4374_v11 = vunpack.i.l.bf16 %v4373_v50 }
 0xa67   :  { %4237 = vmatpush3.bf16.xpose.msk.msra.mxu1 %vm4949_vm13, %v4235_v15  ;;  %4065 = vmatprep.mubr.msk.f32.mxu1 %vm4540_vm5, %v4539_v47 }
 0xa68   :  { %4242 = vmatprep.subr.bf16.mxu1 %v4555_v29  ;;  %v4247_v13 = vpack.c.bf16 %v4375_v52, %v4374_v11 }
 0xa69   :  { %v4368_v3 = vpop.permute.xlu0 %4367  ;;  %v2389_v14 = vpop.permute.xlu1 %2388 }
 0xa6a   :  { %v4370_v5 = vunpack.i.h.bf16 %v4368_v3  ;;  %v4369_v8 = vunpack.i.l.bf16 %v4368_v3  ;;  %4059 = vmatmul.mubr.msk.f32.vlgmr.msra.gmra.mrb[22].mxu0 %vm180_vm6, %v2146_v19 }
 0xa6b   :  { %4241 = vmatpush3.bf16.xpose.msk.msra.mxu0 %vm4949_vm13, %v4239_v42  ;;  %4072 = vmatprep.mubr.msk.f32.mxu0 %vm4540_vm5, %v4539_v47 }
 0xa6c   :  { %v4243_v48 = vpack.c.bf16 %v4370_v5, %v4369_v8  ;;  %4246 = vmatprep.subr.bf16.mxu0 %v4555_v29 }
 0xa6d   :  { %v2307_v9 = vpop.permute.xlu0 %2306  ;;  %v2561_v24 = vpop.permute.xlu1 %2560 }
 0xa6e   :  { %4066 = vmatmul.mubr.msk.f32.vlgmr.msra.gmra.mrb[26].mxu1 %vm180_vm6, %v1782_v49 }
 0xa6f   :  { %4245 = vmatpush3.bf16.xpose.msk.msra.mxu1 %vm4949_vm13, %v4243_v48  ;;  %4079 = vmatprep.mubr.msk.f32.mxu1 %vm4540_vm5, %v4539_v47 }
 0xa70   :  { %4250 = vmatprep.subr.bf16.mxu1 %v4555_v29 }
 0xa71   :  { %v2471_v23 = vpop.permute.xlu0 %2470  ;;  %v2565_v0 = vpop.permute.xlu1 %2564 }
 0xa72   :  { %4073 = vmatmul.mubr.msk.f32.vlgmr.msra.gmra.mrb[24].mxu0 %vm180_vm6, %v2307_v9 }
 0xa73   :  { %4249 = vmatpush3.bf16.xpose.msk.msra.mxu0 %vm4949_vm13, %v4247_v13  ;;  %4086 = vmatprep.mubr.msk.f32.mxu0 %vm4540_vm5, %v4539_v47 }
 0xa74   :  { %4256 = vmatprep.subr.bf16.mxu0 %v4555_v29 }
 0xa75   :  { %v2563_v27 = vpop.permute.xlu0 %2562  ;;  %v2569_v44 = vpop.permute.xlu1 %2568 }
 0xa76   :  { %4080 = vmatmul.mubr.msk.f32.vlgmr.msra.gmra.mrb[28].mxu1 %vm180_vm6, %v2389_v14 }
 0xa77   :  { %4093 = vmatprep.mubr.msk.f32.mxu1 %vm4540_vm5, %v4539_v47 }
 0xa79   :  { %v2567_v38 = vpop.permute.xlu0 %2566  ;;  %v2573_v56 = vpop.permute.xlu1 %2572 }
 0xa7a   :  { %4087 = vmatmul.mubr.msk.f32.vlgmr.msra.gmra.mrb[26].mxu0 %vm180_vm6, %v2471_v23 }
 0xa7b   :  { %4107 = vmatprep.mubr.msk.f32.mxu0 %vm4540_vm5, %v4539_v47 }
 0xa7d   :  { %v2571_v49 = vpop.permute.xlu0 %2570 }
 0xa81   :  { %v2575_v7 = vpop.permute.xlu0 %2574 }
 0xac3   :  { %v1977_v4 = vpop.f32.mrb[22].mxu1 }
 0xac4   :  { %v2584_v25 = vadd.f32 %v2561_v24, %v1977_v4  ;;  %v4039_v26 = vpop.f32.mrb[23].mxu1 }
 0xac6   :  { %v2592_v40 = vsel %vm1213_vm7, %v2584_v25, -inf }
 0xac7   :  { %2593 = vmax.xlane.f32.xlu1 %v2592_v40 }
 0xb35   :  { %v2059_v28 = vpop.f32.mrb[20].mxu0 }
 0xb36   :  { %v2585_v1 = vadd.f32 %v2563_v27, %v2059_v28  ;;  %v4046_v30 = vpop.f32.mrb[21].mxu0 }
 0xb38   :  { %v2595_v32 = vsel %vm1213_vm7, %v2585_v1, -inf }
 0xb39   :  { %2596 = vmax.xlane.f32.xlu0 %v2595_v32  ;;  %v2141_v33 = vpop.f32.mrb[24].mxu1 }
 0xb3a   :  { %v2586_v34 = vadd.f32 %v2565_v0, %v2141_v33  ;;  %v4053_v36 = vpop.f32.mrb[25].mxu1 }
 0xb3c   :  { %v2598_v39 = vsel %vm1213_vm7, %v2586_v34, -inf }
 0xb3d   :  { %v2223_v43 = vpop.f32.mrb[22].mxu0  ;;  %2599 = vmax.xlane.f32.xlu0 %v2598_v39 }
 0xb3e   :  { %v2587_v17 = vadd.f32 %v2567_v38, %v2223_v43  ;;  %v4060_v20 = vpop.f32.mrb[23].mxu0 }
 0xb40   :  { %v2601_v15 = vsel %vm1213_vm7, %v2587_v17, -inf }
 0xb41   :  { %v2302_v16 = vpop.f32.mrb[26].mxu1  ;;  %2602 = vmax.xlane.f32.xlu0 %v2601_v15 }
 0xb42   :  { %v2588_v18 = vadd.f32 %v2569_v44, %v2302_v16  ;;  %v4067_v46 = vpop.f32.mrb[27].mxu1 }
 0xb44   :  { %v2604_v51 = vsel %vm1213_vm7, %v2588_v18, -inf }
 0xb45   :  { %v2384_v53 = vpop.f32.mrb[24].mxu0  ;;  %2605 = vmax.xlane.f32.xlu1 %v2604_v51 }
 0xb46   :  { %v2589_v54 = vadd.f32 %v2571_v49, %v2384_v53  ;;  %v4074_v55 = vpop.f32.mrb[25].mxu0 }
 0xb48   :  { %v2607_v57 = vsel %vm1213_vm7, %v2589_v54, -inf }
 0xb49   :  { %2608 = vmax.xlane.f32.xlu0 %v2607_v57  ;;  %v2466_v58 = vpop.f32.mrb[28].mxu1 }
 0xb4a   :  { %v2590_v60 = vadd.f32 %v2573_v56, %v2466_v58  ;;  %v4081_v6 = vpop.f32.mrb[29].mxu1 }
 0xb4c   :  { %v2610_v61 = vsel %vm1213_vm7, %v2590_v60, -inf }
 0xb4d   :  { %v2548_v62 = vpop.f32.mrb[26].mxu0  ;;  %2611 = vmax.xlane.f32.xlu1 %v2610_v61 }
 0xb4e   :  { %v2591_v21 = vadd.f32 %v2575_v7, %v2548_v62  ;;  %v4088_v2 = vpop.f32.mrb[27].mxu0 }
 0xb50   :  { %v2613_v19 = vsel %vm1213_vm7, %v2591_v21, -inf }
 0xb51   :  { %2614 = vmax.xlane.f32.xlu0 %v2613_v19 }
 0xb54   :  { %v2594_v31 = vpop.xlane.xlu1 %2593 }
 0xb55   :  { %v2616_v35 = vsub.f32 %v2584_v25, %v2594_v31 }
 0xb57   :  { %v2624_v41 = vmul.f32 1.442695, %v2616_v35 }
 0xb59   :  { %4474 = vpow2.f32 %v2624_v41 }
 0xb5e   :  { %4377 = vrot.lane.b32.xlu1 %v4945_v37, %s4538_s21 }
 0xb62   :  { %4387 = vrot.lane.b32.xlu1 %v4945_v37, %s4542_s6 }
 0xb63   :  { %v5059_v42 = vpop.eup %4474 }
 0xb64   :  { %v2640_v3 = vsel %vm1213_vm7, %v5059_v42, 0.0 }
 0xb66   :  { %4392 = vrot.lane.b32.xlu1 %v4945_v37, %s4545_s9 }
 0xb67   :  { %4382 = vrot.lane.b32.xlu0 %v4945_v37, %s4541_s5 }
 0xb6a   :  { %4397 = vrot.lane.b32.xlu1 %v4959_v45, %s4538_s21 }
 0xb6b   :  { %4402 = vrot.lane.b32.xlu0 %v4959_v45, %s4541_s5 }
 0xb8e   :  { %2641 = vadd.xlane.f32.xlu1 %v2640_v3 }
 0xbc6   :  { %v2597_v50 = vpop.xlane.xlu0 %2596 }
 0xbc7   :  { %v2617_v5 = vsub.f32 %v2585_v1, %v2597_v50 }
 0xbc9   :  { %v2626_v8 = vmul.f32 1.442695, %v2617_v5 }
 0xbca   :  { %v2600_v37 = vpop.xlane.xlu0 %2599 }
 0xbcb   :  { %4476 = vpow2.f32 %v2626_v8  ;;  %v2618_v48 = vsub.f32 %v2586_v34, %v2600_v37 }
 0xbcd   :  { %v2628_v52 = vmul.f32 1.442695, %v2618_v48 }
 0xbce   :  { %v2603_v11 = vpop.xlane.xlu0 %2602 }
 0xbcf   :  { %4478 = vpow2.f32 %v2628_v52  ;;  %v2619_v13 = vsub.f32 %v2587_v17, %v2603_v11 }
 0xbd1   :  { %v2630_v9 = vmul.f32 1.442695, %v2619_v13 }
 0xbd2   :  { %v2606_v14 = vpop.xlane.xlu1 %2605 }
 0xbd3   :  { %4480 = vpow2.f32 %v2630_v9  ;;  %v2620_v23 = vsub.f32 %v2588_v18, %v2606_v14 }
 0xbd5   :  { %v5063_v24 = vpop.eup %4476  ;;  %v2632_v4 = vmul.f32 1.442695, %v2620_v23 }
 0xbd6   :  { %v2609_v25 = vpop.xlane.xlu0 %2608  ;;  %v2643_v26 = vsel %vm1213_vm7, %v5063_v24, 0.0 }
 0xbd7   :  { %4482 = vpow2.f32 %v2632_v4  ;;  %v2621_v40 = vsub.f32 %v2589_v54, %v2609_v25  ;;  %2644 = vadd.xlane.f32.xlu0 %v2643_v26 }
 0xbd9   :  { %v5067_v27 = vpop.eup %4478  ;;  %v2634_v28 = vmul.f32 1.442695, %v2621_v40 }
 0xbda   :  { %v2612_v1 = vpop.xlane.xlu1 %2611  ;;  %v2646_v30 = vsel %vm1213_vm7, %v5067_v27, 0.0 }
 0xbdb   :  { %4484 = vpow2.f32 %v2634_v28  ;;  %v2622_v0 = vsub.f32 %v2590_v60, %v2612_v1  ;;  %2647 = vadd.xlane.f32.xlu1 %v2646_v30 }
 0xbdd   :  { %v5071_v32 = vpop.eup %4480  ;;  %v2636_v33 = vmul.f32 1.442695, %v2622_v0 }
 0xbde   :  { %v2615_v34 = vpop.xlane.xlu0 %2614  ;;  %v4378_v36 = vpop.permute.xlu1 %4377  ;;  %v2649_v38 = vsel %vm1213_vm7, %v5071_v32, 0.0 }
 0xbdf   :  { %4486 = vpow2.f32 %v2636_v33  ;;  %v2623_v39 = vsub.f32 %v2591_v21, %v2615_v34  ;;  %v4380_v43 = vunpack.i.h.bf16 %v4378_v36  ;;  %v4379_v17 = vunpack.i.l.bf16 %v4378_v36  ;;  %2650 = vadd.xlane.f32.xlu0 %v2649_v38 }
 0xbe1   :  { %v5075_v20 = vpop.eup %4482  ;;  %v2638_v44 = vmul.f32 1.442695, %v2623_v39  ;;  %v4251_v15 = vpack.c.bf16 %v4380_v43, %v4379_v17 }
 0xbe2   :  { %v4388_v16 = vpop.permute.xlu1 %4387  ;;  %v2652_v18 = vsel %vm1213_vm7, %v5075_v20, 0.0  ;;  %v4383_v61 = vpop.permute.xlu0 %4382 }
 0xbe3   :  { %4488 = vpow2.f32 %v2638_v44  ;;  %v4390_v46 = vunpack.i.h.bf16 %v4388_v16  ;;  %2653 = vadd.xlane.f32.xlu1 %v2652_v18  ;;  %4252 = vmatpush3.bf16.msra.mxu1 %v4251_v15  ;;  %v4389_v49 = vunpack.i.l.bf16 %v4388_v16  ;;  %v4385_v62 = vunpack.i.h.bf16 %v4383_v61 }
 0xbe4   :  { %4253 = vmatprep.subr.bf16.mxu1 %v4555_v29  ;;  %v4384_v21 = vunpack.i.l.bf16 %v4383_v61 }
 0xbe5   :  { %v5080_v51 = vpop.eup %4484  ;;  %v4257_v53 = vpack.c.bf16 %v4390_v46, %v4389_v49 }
 0xbe6   :  { %v2655_v54 = vsel %vm1213_vm7, %v5080_v51, 0.0  ;;  %v4393_v60 = vpop.permute.xlu1 %4392  ;;  %v4254_v31 = vpack.c.bf16 %v4385_v62, %v4384_v21 }
 0xbe7   :  { %2656 = vadd.xlane.f32.xlu0 %v2655_v54  ;;  %4258 = vmatpush3.bf16.msra.mxu0 %v4257_v53  ;;  %v4395_v50 = vunpack.i.h.bf16 %v4393_v60  ;;  %v4394_v5 = vunpack.i.l.bf16 %v4393_v60 }
 0xbe8   :  { %4262 = vmatprep.subr.bf16.mxu0 %v4555_v29 }
 0xbe9   :  { %v5084_v55 = vpop.eup %4486  ;;  %v4260_v48 = vpack.c.bf16 %v4395_v50, %v4394_v5 }
 0xbea   :  { %v2658_v56 = vsel %vm1213_vm7, %v5084_v55, 0.0  ;;  %v4398_v6 = vpop.permute.xlu1 %4397 }
 0xbeb   :  { %2659 = vadd.xlane.f32.xlu1 %v2658_v56  ;;  %v4400_v52 = vunpack.i.h.bf16 %v4398_v6  ;;  %v4399_v11 = vunpack.i.l.bf16 %v4398_v6 }
 0xbed   :  { %v5089_v57 = vpop.eup %4488 }
 0xbee   :  { %v2661_v58 = vsel %vm1213_vm7, %v5089_v57, 0.0 }
 0xbef   :  { %2662 = vadd.xlane.f32.xlu0 %v2661_v58 }
 0xbfc   :  { %4407 = vrot.lane.b32.xlu1 %v4959_v45, %s4542_s6 }
 0xc00   :  { %4417 = vrot.lane.b32.xlu1 %v4894_v59, %s4551_s30 }
 0xc05   :  { %4412 = vrot.lane.b32.xlu0 %v4959_v45, %s4545_s9  ;;  %v4403_v45 = vpop.permute.xlu0 %4402 }
 0xc06   :  { %v4405_v23 = vunpack.i.h.bf16 %v4403_v45  ;;  %v4404_v4 = vunpack.i.l.bf16 %v4403_v45 }
 0xc09   :  { %4422 = vrot.lane.b32.xlu0 %v4908_v63, %s4551_s30 }
 0xc1b   :  { %v2642_v7 = vpop.xlane.xlu1 %2641 }
 0xc1c   :  { %4490 = vrcp.f32 %v2642_v7 }
 0xc26   :  { %v4491_v2 = vpop.eup %4490 }
 0xc27   :  { %v2672_v19 = vmul.f32 %v4491_v2, %v5059_v42 }
 0xc29   :  { %4094 = vmatmul.mubr.msk.f32.vlgmr.msra.gmra.mrb[30].mxu1 %vm1213_vm7, %v2672_v19 }
 0xc2a   :  { %4255 = vmatpush3.bf16.msra.mxu1 %v4254_v31  ;;  %4100 = vmatprep.mubr.msk.f32.mxu1 %vm4540_vm5, %v4539_v47 }
 0xc2b   :  { %4259 = vmatprep.subr.bf16.mxu1 %v4555_v29 }
 0xc64   :  { %v2645_v35 = vpop.xlane.xlu0 %2644 }
 0xc65   :  { %4492 = vrcp.f32 %v2645_v35 }
 0xc68   :  { %v2648_v41 = vpop.xlane.xlu1 %2647 }
 0xc69   :  { %4494 = vrcp.f32 %v2648_v41 }
 0xc6c   :  { %v2651_v3 = vpop.xlane.xlu0 %2650 }
 0xc6d   :  { %4496 = vrcp.f32 %v2651_v3 }
 0xc6f   :  { %v4493_v8 = vpop.eup %4492 }
 0xc70   :  { %v2673_v42 = vmul.f32 %v4493_v8, %v5063_v24  ;;  %v2654_v37 = vpop.xlane.xlu1 %2653  ;;  %v4263_v24 = vpack.c.bf16 %v4400_v52, %v4399_v11 }
 0xc71   :  { %4498 = vrcp.f32 %v2654_v37 }
 0xc72   :  { %4101 = vmatmul.mubr.msk.f32.vlgmr.msra.gmra.mrb[32].mxu1 %vm1213_vm7, %v2673_v42 }
 0xc73   :  { %v4495_v13 = vpop.eup %4494  ;;  %4261 = vmatpush3.bf16.msra.mxu1 %v4260_v48  ;;  %4114 = vmatprep.mubr.msk.f32.mxu1 %vm4540_vm5, %v4539_v47 }
 0xc74   :  { %v2674_v9 = vmul.f32 %v4495_v13, %v5067_v27  ;;  %v2657_v14 = vpop.xlane.xlu0 %2656  ;;  %4265 = vmatprep.subr.bf16.mxu1 %v4555_v29  ;;  %v4266_v27 = vpack.c.bf16 %v4405_v23, %v4404_v4 }
 0xc75   :  { %4500 = vrcp.f32 %v2657_v14 }
 0xc76   :  { %4108 = vmatmul.mubr.msk.f32.vlgmr.msra.gmra.mrb[28].mxu0 %vm1213_vm7, %v2674_v9 }
 0xc77   :  { %v4497_v25 = vpop.eup %4496  ;;  %4264 = vmatpush3.bf16.msra.mxu0 %v4263_v24  ;;  %4121 = vmatprep.mubr.msk.f32.mxu0 %vm4540_vm5, %v4539_v47 }
 0xc78   :  { %v2675_v26 = vmul.f32 %v4497_v25, %v5071_v32  ;;  %v2660_v40 = vpop.xlane.xlu1 %2659  ;;  %4268 = vmatprep.subr.bf16.mxu0 %v4555_v29 }
 0xc79   :  { %4502 = vrcp.f32 %v2660_v40 }
 0xc7a   :  { %4115 = vmatmul.mubr.msk.f32.vlgmr.msra.gmra.mrb[34].mxu1 %vm1213_vm7, %v2675_v26 }
 0xc7b   :  { %v4499_v28 = vpop.eup %4498  ;;  %4267 = vmatpush3.bf16.msra.mxu1 %v4266_v27  ;;  %4128 = vmatprep.mubr.msk.f32.mxu1 %vm4540_vm5, %v4539_v47 }
 0xc7c   :  { %v2676_v1 = vmul.f32 %v4499_v28, %v5075_v20  ;;  %v2663_v30 = vpop.xlane.xlu0 %2662  ;;  %v4408_v0 = vpop.permute.xlu1 %4407  ;;  %4271 = vmatprep.subr.bf16.mxu1 %v4555_v29 }
 0xc7d   :  { %4504 = vrcp.f32 %v2663_v30  ;;  %v4410_v32 = vunpack.i.h.bf16 %v4408_v0  ;;  %v4409_v33 = vunpack.i.l.bf16 %v4408_v0 }
 0xc7e   :  { %4122 = vmatmul.mubr.msk.f32.vlgmr.msra.gmra.mrb[30].mxu0 %vm1213_vm7, %v2676_v1 }
 0xc7f   :  { %v4501_v34 = vpop.eup %4500  ;;  %v4269_v36 = vpack.c.bf16 %v4410_v32, %v4409_v33  ;;  %4135 = vmatprep.mubr.msk.f32.mxu0 %vm4540_vm5, %v4539_v47 }
 0xc80   :  { %v2677_v38 = vmul.f32 %v4501_v34, %v5080_v51  ;;  %v4413_v39 = vpop.permute.xlu0 %4412  ;;  %v4418_v16 = vpop.permute.xlu1 %4417 }
 0xc81   :  { %v4415_v43 = vunpack.i.h.bf16 %v4413_v39  ;;  %v4414_v17 = vunpack.i.l.bf16 %v4413_v39  ;;  %4270 = vmatpush3.bf16.msra.mxu0 %v4269_v36  ;;  %v4420_v18 = vunpack.i.h.bf16 %v4418_v16  ;;  %v4419_v46 = vunpack.i.l.bf16 %v4418_v16  ;;  %v3493_v39 = vld [vmem:[%s5234_s3 + $0x48] sm:$0xff]  ;;  %v3587_v16 = vld [vmem:[%s5234_s3 + $0x78] sm:$0xff] }
 0xc82   :  { %4129 = vmatmul.mubr.msk.f32.vlgmr.msra.gmra.mrb[36].mxu1 %vm1213_vm7, %v2677_v38  ;;  %v3772_v38 = vld [vmem:[%s5234_s3 + $0x1] ss:$0 sm:$0xff] }
 0xc83   :  { %v4503_v29 = vpop.eup %4502  ;;  %v4272_v20 = vpack.c.bf16 %v4415_v43, %v4414_v17  ;;  %4142 = vmatprep.mubr.msk.f32.mxu1 %vm4540_vm5, %v4539_v47  ;;  %v4274_v49 = vpack.c.bf16 %v4420_v18, %v4419_v46  ;;  %v3494_v43 = vld [vmem:[%s5234_s3 + $0x50] sm:$0xff]  ;;  %v3588_v46 = vld [vmem:[%s5234_s3 + $0x80] sm:$0xff] }
 0xc84   :  { %v2678_v44 = vmul.f32 %v4503_v29, %v5084_v55  ;;  %v4423_v53 = vpop.permute.xlu0 %4422  ;;  %v4282_v17 = vpack.c.bf16 %v3494_v43, %v3493_v39  ;;  %v3495_v29 = vld [vmem:[%s5234_s3 + $0x58] sm:$0xff] }
 0xc85   :  { %4273 = vmatpush3.bf16.msra.mxu1 %v4272_v20  ;;  %4275 = vmatprep.subr.bf16.mxu0 %v4274_v49  ;;  %v4425_v54 = vunpack.i.h.bf16 %v4423_v53  ;;  %v4424_v55 = vunpack.i.l.bf16 %v4423_v53  ;;  %v3496_v20 = vld [vmem:[%s5234_s3 + $0x60] sm:$0xff] }
 0xc86   :  { %4136 = vmatmul.mubr.msk.f32.vlgmr.msra.gmra.mrb[32].mxu0 %vm1213_vm7, %v2678_v44  ;;  %4283 = vmatprep.subr.bf16.mxu1 %v4282_v17  ;;  %v4286_v44 = vpack.c.bf16 %v3496_v20, %v3495_v29 }
 0xc87   :  { %v4505_v15 = vpop.eup %4504  ;;  %4277 = vmatpush3.bf16.msra.mxu0 %v4274_v49  ;;  %v4278_v56 = vpack.c.bf16 %v4425_v54, %v4424_v55  ;;  %v4294_v49 = vpack.c.bf16 %v3588_v46, %v3587_v16 }
 0xc88   :  { %v2679_v59 = vmul.f32 %v4505_v15, %v5089_v57  ;;  %v3585_v15 = vld [vmem:[%s5234_s3 + $0x68] sm:$0xff] }
 0xc89   :  { %4279 = vmatprep.subr.bf16.mxu0 %v4278_v56 }
 0xc8a   :  { %4143 = vmatmul.mubr.msk.f32.vlgmr.msra.gmra.mrb[38].mxu1 %vm1213_vm7, %v2679_v59  ;;  %v3586_v59 = vld [vmem:[%s5234_s3 + $0x70] sm:$0xff] }
 0xc8b   :  { %4281 = vmatpush3.bf16.msra.mxu0 %v4278_v56  ;;  %4285 = vmatpush3.bf16.msra.mxu1 %v4282_v17  ;;  %v4290_v18 = vpack.c.bf16 %v3586_v59, %v3585_v15 }
 0xc8c   :  { %4287 = vmatprep.subr.bf16.mxu1 %v4286_v44 }
 0xc8d   :  { %4291 = vmatprep.subr.bf16.mxu0 %v4290_v18 }
 0xc8f   :  { %4289 = vmatpush3.bf16.msra.mxu1 %v4286_v44 }
 0xcfc   :  { %v2755_v47 = vpop.f32.mrb[30].mxu1 }
 0xcfd   :  { %v4095_v51 = vpop.f32.mrb[31].mxu1 }
 0xcfe   :  { %v3590_v51 = vld [vmem:[%s5234_s3 + $0x90] sm:$0xff] }
 0xd45   :  { %v2834_v57 = vpop.f32.mrb[32].mxu1 }
 0xd46   :  { %2997 = vrot.lane.b32.xlu1 %v2834_v57, %s4553_s12  ;;  %v4102_v58 = vpop.f32.mrb[33].mxu1 }
 0xd49   :  { %v2913_v60 = vpop.f32.mrb[28].mxu0 }
 0xd4a   :  { %3001 = vrot.lane.b32.xlu0 %v2913_v60, %s4552_s11  ;;  %v4109_v63 = vpop.f32.mrb[29].mxu0 }
 0xd4d   :  { %v2992_v6 = vpop.f32.mrb[34].mxu1 }
 0xd4e   :  { %3005 = vrot.lane.b32.xlu0 %v2992_v6, %s4554_s13  ;;  %v4116_v7 = vpop.f32.mrb[35].mxu1 }
 0xd51   :  { %v3086_v61 = vpop.f32.mrb[30].mxu0 }
 0xd52   :  { %v4123_v62 = vpop.f32.mrb[31].mxu0 }
 0xd55   :  { %v3165_v21 = vpop.f32.mrb[36].mxu1 }
 0xd56   :  { %3328 = vrot.lane.b32.xlu1 %v3165_v21, %s4553_s12  ;;  %v4130_v2 = vpop.f32.mrb[37].mxu1 }
 0xd59   :  { %v3244_v19 = vpop.f32.mrb[32].mxu0 }
 0xd5a   :  { %v4137_v31 = vpop.f32.mrb[33].mxu0  ;;  %3332 = vrot.lane.b32.xlu1 %v3244_v19, %s4552_s11 }
 0xd5d   :  { %v3323_v45 = vpop.f32.mrb[38].mxu1 }
 0xd5e   :  { %3336 = vrot.lane.b32.xlu0 %v3323_v45, %s4554_s13  ;;  %v4144_v35 = vpop.f32.mrb[39].mxu1  ;;  %3354 = vrot.lane.b32.xlu1 %v4919_v10, %s4551_s30 }
 0xdb8   :  { %v2998_v41 = vpop.permute.xlu1 %2997 }
 0xdb9   :  { %v3008_v50 = vsel %vm180_vm6, %v2755_v47, %v2998_v41  ;;  %v3589_v47 = vld [vmem:[%s5234_s3 + $0x88] sm:$0xff] }
 0xdba   :  { %v4298_v53 = vpack.c.bf16 %v3590_v51, %v3589_v47 }
 0xdbc   :  { %v3002_v3 = vpop.permute.xlu0 %3001 }
 0xdbd   :  { %v3009_v5 = vsel %vm1213_vm7, %v3008_v50, %v3002_v3 }
 0xdc0   :  { %v3006_v8 = vpop.permute.xlu0 %3005 }
 0xdc1   :  { %v3010_v42 = vsel %vm1215_vm8, %v3009_v5, %v3006_v8 }
 0xdc2   :  { %4153 = vmatprep.mubr.msk.f32.mxu0 %vm33_vm0, %v3010_v42 }
 0xdc8   :  { %v3329_v37 = vpop.permute.xlu1 %3328 }
 0xdc9   :  { %v3339_v52 = vsel %vm180_vm6, %v3086_v61, %v3329_v37 }
 0xdcc   :  { %v3333_v48 = vpop.permute.xlu1 %3332 }
 0xdcd   :  { %v3340_v11 = vsel %vm1213_vm7, %v3339_v52, %v3333_v48  ;;  %v3773_v52 = vld [vmem:[%s5234_s3 + $0x4] ss:$0 sm:$0xff] }
 0xdd0   :  { %v3337_v13 = vpop.permute.xlu0 %3336  ;;  %v3355_v9 = vpop.permute.xlu1 %3354 }
 0xdd1   :  { %v3341_v10 = vsel %vm1215_vm8, %v3340_v11, %v3337_v13  ;;  %v3591_v11 = vld [vmem:[%s5234_s3 + $0x98] sm:$0xff]  ;;  %v3592_v13 = vld [vmem:[%s5234_s3 + $0xa0] sm:$0xff]  ;;  %s4556_s3 = smov [#allocation2]  }
 0xdd2   :  { %4154 = vmatmul.mubr.msk.f32.vlgmr.msra.gmra.mrb[34].mxu0 %vm33_vm0, %v3341_v10  ;;  %v4302_v10 = vpack.c.bf16 %v3592_v13, %v3591_v11  ;;  %s3690_s5 = sshll.u32 %s4556_s3, 4  ;;  %s3691_s5 = int_to_ptr.vmem [resolvable:$true] %s3690_s5 }
 0xdd3   :  { %4293 = vmatpush3.bf16.msra.mxu0 %v4290_v18  ;;  %p4519_p1 = scmp.lt.s32.totalorder %s3691_s5, %s3691_s5 }
 0xdd4   :  { %4295 = vmatprep.subr.bf16.mxu0 %v4294_v49 }
 0xdd7   :  { %4297 = vmatpush3.bf16.msra.mxu0 %v4294_v49 }
 0xdd8   :  { %4299 = vmatprep.subr.bf16.mxu0 %v4298_v53 }
 0xddb   :  { %4301 = vmatpush3.bf16.msra.mxu0 %v4298_v53 }
 0xddc   :  { %4303 = vmatprep.subr.bf16.mxu0 %v4302_v10 }
 0xddf   :  { %4305 = vmatpush3.bf16.msra.mxu0 %v4302_v10 }
 0xea5   :  { %v4155_v14 = vpop.f32.mrb[34].mxu0 }
 0xea6   :  { %v3435_v23 = vadd.f32 %v4155_v14, %v3355_v9  ;;  %v3429_v4 = vpop.f32.mrb[35].mxu0 }
 0xea7   :  { %v3430_v24 = vadd.f32 %v3429_v4, %v3355_v9 }
 0xea8   :  { %v5150_v25 = vadd.f32 %v3435_v23, %v4873_v12 }
 0xea9   :  { %v5153_v26 = vadd.f32 %v3430_v24, %v4876_v22 }
 0xeaa   :  { %v3444_v40 = vsel %vm33_vm0, %v5150_v25, 0.0 }
 0xeab   :  { %3445 = vadd.xlane.f32.xlu1 %v3444_v40  ;;  %v3441_v27 = vsel %vm33_vm0, %v5153_v26, 0.0 }
 0xeac   :  { %3442 = vadd.xlane.f32.xlu0 %v3441_v27 }
 0xebc   :  { %3678 = vrot.lane.b32.xlu1 %v3773_v52, %s4547_s27  ;;  %s4514_s27 = scalar_lea.vmem %s3691_s5, 256 }
 0xebd   :  { %p4515_p0 = scmp.ne.s32.totalorder %s3691_s5, %s4514_s27  ;;  %p4520_p2 = scmp.lt.s32.totalorder %s4514_s27, %s4514_s27 }
 0xebf   :  { %p4521_p3 = por %p4520_p2, %p4519_p1 }
 0xec1   :  { %p4522_p4 = pnand %p4521_p3, %p4515_p0 }
 0xf38   :  { %v3446_v28 = vpop.xlane.xlu1 %3445 }
 0xf39   :  { %v3448_v1 = vmul.f32 0.03125, %v3446_v28  ;;  %v3443_v30 = vpop.xlane.xlu0 %3442 }
 0xf3a   :  { %v3447_v0 = vmul.f32 0.03125, %v3443_v30 }
 0xf3b   :  { %v5160_v32 = vsub.f32 %v5150_v25, %v3448_v1 }
 0xf3c   :  { %v3449_v12 = vsub.f32 %v5153_v26, %v3447_v0  ;;  %v3679_v28 = vpop.permute.xlu1 %3678 }
 0xf3d   :  { %v3452_v34 = vmul.f32 %v5160_v32, %v5160_v32 }
 0xf3e   :  { %v3451_v33 = vmul.f32 %v3449_v12, %v3449_v12 }
 0xf3f   :  { %v3456_v36 = vsel %vm33_vm0, %v3452_v34, 0.0 }
 0xf40   :  { %v3453_v22 = vsel %vm33_vm0, %v3451_v33, 0.0 }
 0xf41   :  { %3454 = vadd.xlane.f32.xlu0 %v3453_v22 }
 0xf45   :  { %3457 = vadd.xlane.f32.xlu0 %v3456_v36 }
 0xf5b   :  { %3488 = vrot.lane.b32.xlu0 %v3772_v38, %s4538_s21 }
 0xfce   :  { %v3455_v54 = vpop.xlane.xlu0 %3454 }
 0xfcf   :  { %v3459_v55 = vmul.f32 0.032258064, %v3455_v54 }
 0xfd1   :  { %4506 = vrsqrt.f32 %v3459_v55  ;;  %vm3463_vm14 = vcmp.eq.f32.partialorder %v3459_v55, inf  ;;  %v3466_v63 = vand.u32 2147483648, %v3459_v55  ;;  %vm3465_vm15 = vcmp.eq.f32.partialorder %v3459_v55, 0.0 }
 0xfd2   :  { %v3458_v56 = vpop.xlane.xlu0 %3457 }
 0xfd3   :  { %v3460_v57 = vmul.f32 0.032258064, %v3458_v56 }
 0xfd5   :  { %4508 = vrsqrt.f32 %v3460_v57  ;;  %vm3470_vm1 = vcmp.eq.f32.partialorder %v3460_v57, inf  ;;  %v3473_v2 = vand.u32 2147483648, %v3460_v57  ;;  %vm3472_vm2 = vcmp.eq.f32.partialorder %v3460_v57, 0.0 }
 0xfd6   :  { %v3489_v3 = vpop.permute.xlu0 %3488 }
 0xfdb   :  { %v4507_v58 = vpop.eup %4506 }
 0xfdc   :  { %v3462_v60 = vmul.f32 %v4507_v58, %v3459_v55 }
 0xfde   :  { %v3464_v6 = vsel %vm3463_vm14, %v3459_v55, %v3462_v60 }
 0xfdf   :  { %v4509_v7 = vpop.eup %4508  ;;  %v3467_v61 = vsel %vm3465_vm15, %v3466_v63, %v3464_v6 }
 0xfe0   :  { %v3469_v62 = vmul.f32 %v4509_v7, %v3460_v57  ;;  %v3475_v21 = vadd.f32 1e-06, %v3467_v61 }
 0xfe2   :  { %v3471_v19 = vsel %vm3470_vm1, %v3460_v57, %v3469_v62  ;;  %4510 = vrcp.f32 %v3475_v21 }
 0xfe3   :  { %v3474_v31 = vsel %vm3472_vm2, %v3473_v2, %v3471_v19 }
 0xfe4   :  { %v3476_v45 = vadd.f32 1e-06, %v3474_v31 }
 0xfe6   :  { %4512 = vrcp.f32 %v3476_v45 }
 0xfec   :  { %v4511_v35 = vpop.eup %4510 }
 0xfed   :  { %v3479_v41 = vmul.f32 %v4511_v35, %v3449_v12 }
 0xfef   :  { %v3485_v50 = vmul.f32 %v3772_v38, %v3479_v41 }
 0xff0   :  { %v4513_v5 = vpop.eup %4512 }
 0xff1   :  { %v3480_v8 = vmul.f32 %v4513_v5, %v5160_v32  ;;  %v3491_v42 = vadd.f32 %v3489_v3, %v3485_v50 }
 0xff3   :  { %v3486_v37 = vmul.f32 %v3772_v38, %v3480_v8  ;;  %4164 = vmatprep.mubr.msk.f32.mxu1 %vm33_vm0, %v3491_v42 }
 0xff5   :  { %v3492_v48 = vadd.f32 %v3489_v3, %v3486_v37 }
 0xff7   :  { %4165 = vmatmul.mubr.msk.f32.vlgmr.msra.gmra.mrb[40].mxu1 %vm33_vm0, %v3492_v48 }
0x10ca   :  { %v4166_v9 = vpop.f32.mrb[40].mxu1 }
0x10cb   :  { %v3580_v14 = vadd.f32 %v4166_v9, %v3773_v52  ;;  %v3574_v23 = vpop.f32.mrb[41].mxu1 }
0x10cc   :  { %v3575_v4 = vadd.f32 %v3773_v52, %v3574_v23 }
0x10cd   :  { %v3584_v40 = vmax.f32 %v3580_v14, 0.0 }
0x10ce   :  { %v3583_v24 = vmax.f32 %v3575_v4, 0.0 }
0x10d0   :  { %4183 = vmatprep.mubr.msk.f32.mxu0 %vm3593_vm3, %v3583_v24 }
0x10d1   :  { %4184 = vmatmul.mubr.msk.f32.vlgmr.msra.gmra.mrb[36].mxu0 %vm3593_vm3, %v3584_v40 }
0x11a4   :  { %v4185_v27 = vpop.f32.mrb[36].mxu0 }
0x11a5   :  { %v3676_v1 = vadd.f32 %v4185_v27, %v5150_v25  ;;  %v3666_v30 = vpop.f32.mrb[37].mxu0 }
0x11a6   :  { %v3675_v0 = vadd.f32 %v3666_v30, %v5153_v26 }
0x11a7   :  { %v3682_v32 = vadd.f32 %v3679_v28, %v3676_v1 }
0x11a8   :  { %v3681_v12 = vadd.f32 %v3679_v28, %v3675_v0 }
0x11a9   :  { %3684 = vst.msk [vmem:[#allocation2 + $0x8] sm:$0xff] %vm33_vm0, %v3682_v32 }
0x11aa   :  { %3683 = vst.msk [vmem:[#allocation2] sm:$0xff] %vm33_vm0, %v3681_v12 }
0x11ab   :  { %4525 = shalt.err (!%p4522_p4)
}
0x11ac   :  { %s4526_s8 = scalar_lea.hbm %s5235_s4, 256 }
0x11ad   :  { %p4527_p5 = scmp.ne.s32.totalorder %s5235_s4, %s4526_s8  ;;  %p4530_p6 = scmp.lt.u32.totalorder %s4526_s8, %s5235_s4 }
0x11af   :  { %p4532_p7 = pnand %p4530_p6, %p4527_p5 }
0x11b1   :  { %4535 = shalt.err (!%p4532_p7)
}
0x11b2   :  { %s4557_s13 = smov 128  }
0x11b3   :  { %3696 = dma.vmem_to_hbm [thread:$0]  %s3691_s5, 256, %s5235_s4, [#allocation3], %s4557_s13, %s4557_s13, %s4553_s12  }
0x11b4   :  { %4536 = dma.done.wait [#allocation3], 256  }
0x11b5   :  { %4537 = vsyncadd [#allocation3], 4294967040 }
0x11b6   :  { %3700 = vsyncpa [#allocation3], 1 }

</bundles_post_ra>
